<compile_context>
chip_gen: v6e
topology: v6e:2x2x1
jax: 0.10.0
libtpu: 0.0.40
codegen_flags: <defaults>
</compile_context>

<pallas_src>
import functools

import jax
import jax.numpy as jnp
from jax.experimental import pallas as pl
from jax.experimental.pallas import tpu as pltpu


_VMEM_BUDGET = 40 * 1024 * 1024  # v7x-safe working-set budget (64 MiB/TC).


def _round_up(x, m):
    return ((x + m - 1) // m) * m


def _vmem_limit(need_bytes):
    # Headroom for compiler-internal scratch; never above v7x's physical VMEM.
    return int(min(max(int(need_bytes * 1.5), 32 * 1024 * 1024), 60 * 1024 * 1024))


# ---------------------------------------------------------------------------
# Kernels
# ---------------------------------------------------------------------------
def _rou_resident_kernel(x_ref, wt_ref, b_ref, o_ref):
    """Weight fully VMEM-resident: one grid step = one M row-tile.

    o = tanh(x @ W_t + b) with full (padded) K and S inside the block.
    """
    acc = jnp.dot(x_ref[...], wt_ref[...], preferred_element_type=jnp.float32)
    o_ref[...] = jnp.tanh(acc + b_ref[...].astype(jnp.float32)).astype(o_ref.dtype)


def _rou_tiled_kernel_f32(x_ref, wt_ref, b_ref, o_ref):
    """(M, N, K)-tiled fallback, f32 output: accumulate directly into o_ref
    (its block index is constant across k, so it stays VMEM-resident)."""
    k = pl.program_id(2)

    @pl.when(k == 0)
    def _init():
        o_ref[...] = jnp.zeros_like(o_ref)

    o_ref[...] += jnp.dot(x_ref[...], wt_ref[...], preferred_element_type=jnp.float32)

    @pl.when(k == pl.num_programs(2) - 1)
    def _epilogue():
        o_ref[...] = jnp.tanh(o_ref[...] + b_ref[...].astype(jnp.float32))


def _rou_tiled_kernel_acc(x_ref, wt_ref, b_ref, o_ref, acc_ref):
    """(M, N, K)-tiled fallback for non-f32 outputs: f32 scratch accumulator."""
    k = pl.program_id(2)

    @pl.when(k == 0)
    def _init():
        acc_ref[...] = jnp.zeros_like(acc_ref)

    acc_ref[...] += jnp.dot(x_ref[...], wt_ref[...], preferred_element_type=jnp.float32)

    @pl.when(k == pl.num_programs(2) - 1)
    def _epilogue():
        y = acc_ref[...] + b_ref[...].astype(jnp.float32)
        o_ref[...] = jnp.tanh(y).astype(o_ref.dtype)


# ---------------------------------------------------------------------------
# Tile selection
# ---------------------------------------------------------------------------
def _choose_tm(n_rows, max_tm=512):
    """Pick a sublane-aligned (multiple-of-8) M tile minimizing padded rows.

    Prefers >= 2 equal tiles (so the 'parallel' M axis can shard across the
    two v7x TensorCores).  Returns (tm, padded_rows).
    """
    max_tm = max(8, (max_tm // 8) * 8)
    m8 = _round_up(n_rows, 8)
    if m8 <= max_tm:
        half = m8 // 2
        if m8 >= 16 and half % 8 == 0:
            return half, m8           # two equal tiles, zero padding
        return m8, m8                 # single tile, zero padding
    best_tm, best_waste = max_tm, None
    for tm in range(max_tm, 7, -8):
        waste = _round_up(m8, tm) - m8
        if best_waste is None or waste < best_waste:
            best_tm, best_waste = tm, waste
        if waste == 0:
            break
    return best_tm, _round_up(m8, best_tm)


def _choose_div_tile(size, max_t):
    """Largest multiple-of-128 tile <= max_t that exactly divides `size`
    (size is already a multiple of 128, so 128 always qualifies => no padding)."""
    if size <= max_t:
        return size
    for t in range(max_t - (max_t % 128), 127, -128):
        if size % t == 0:
            return t
    return 128


# ---------------------------------------------------------------------------
# Parameter prep (one-time, the nn.Module __init__ analogue)
# ---------------------------------------------------------------------------
def rou_init_params(weight, bias):
    """weight: [s, ln] (nn.Linear convention), bias: [s].

    Returns (W_t [lnp, sp], bias [1, sp]) transposed + zero-padded once so the
    forward pass never re-pads / re-copies the static parameters.
    """
    s, ln = weight.shape
    lnp, sp = _round_up(ln, 128), _round_up(s, 128)
    wt_p = jnp.zeros((lnp, sp), weight.dtype).at[:ln, :s].set(weight.T)
    b_p = jnp.zeros((1, sp), bias.dtype).at[0, :s].set(bias)
    return wt_p, b_p


# ---------------------------------------------------------------------------
# Forward
# ---------------------------------------------------------------------------
def _rou_forward(x, wt_p, b_p, *, ln, s, force_tiled=False, force_pallas=False):
    """tanh(x @ W^T + b).  x: [..., ln]; wt_p/b_p from rou_init_params."""
    *lead, ln_in = x.shape
    assert ln_in == ln, (ln_in, ln)
    x2 = x.reshape(-1, ln)
    n_rows = x2.shape[0]
    lnp, sp = wt_p.shape

    xb = jnp.dtype(x.dtype).itemsize
    wb = jnp.dtype(wt_p.dtype).itemsize
    bb = jnp.dtype(b_p.dtype).itemsize
    out_dtype = x.dtype
    ob = jnp.dtype(out_dtype).itemsize

    # Tiny problems: pallas_call launch overhead dwarfs the work; fused XLA.
    if not (force_pallas or force_tiled) and (n_rows * ln * s) < (1 << 20):
        out = jnp.tanh(x2 @ wt_p[:ln, :s] + b_p[0, :s])
        return out.reshape(*lead, s)

    # ---- choose path: weight-resident (fast) vs fully tiled (big weights).
    w_resident_bytes = 2 * lnp * sp * wb + 2 * sp * bb   # worst-case 2 buffers
    use_resident = (not force_tiled) and w_resident_bytes <= int(0.75 * _VMEM_BUDGET)
    tm_cap = 512
    if use_resident:
        per_row_bytes = 2 * (lnp * xb + sp * ob)          # X tile + out tile, 2-buf
        tm_cap = (_VMEM_BUDGET - w_resident_bytes) // per_row_bytes
        if tm_cap < 8:
            use_resident = False

    if use_resident:
        tm, m_pad = _choose_tm(n_rows, max_tm=min(512, int(tm_cap)))
    else:
        tm, m_pad = _choose_tm(n_rows, max_tm=512)

    # Per-call padding of the activations ONLY (params pre-padded at init).
    # K zero-padding contributes nothing; padded rows are sliced off below.
    pad_m, pad_k = m_pad - n_rows, lnp - ln
    if pad_m or pad_k:
        x2 = jnp.pad(x2, ((0, pad_m), (0, pad_k)))

    if use_resident:
        grid = (m_pad // tm,)
        vmem_need = 2 * tm * lnp * xb + w_resident_bytes + 2 * tm * sp * ob
        out_p = pl.pallas_call(
            _rou_resident_kernel,
            out_shape=jax.ShapeDtypeStruct((m_pad, sp), out_dtype),
            grid_spec=pltpu.PrefetchScalarGridSpec(
                num_scalar_prefetch=0,
                grid=grid,
                in_specs=[
                    pl.BlockSpec((tm, lnp), lambda i: (i, 0)),   # X row-tile
                    pl.BlockSpec((lnp, sp), lambda i: (0, 0)),   # W_t: resident
                    pl.BlockSpec((1, sp), lambda i: (0, 0)),     # bias: resident
                ],
                out_specs=pl.BlockSpec((tm, sp), lambda i: (i, 0)),
            ),
            compiler_params=pltpu.CompilerParams(
                dimension_semantics=("parallel",),
                vmem_limit_bytes=_vmem_limit(vmem_need),
            ),
            cost_estimate=pl.CostEstimate(
                flops=2 * m_pad * lnp * sp,
                transcendentals=m_pad * sp,
                bytes_accessed=m_pad * lnp * xb + lnp * sp * wb
                + m_pad * sp * ob + sp * bb,
            ),
        )(x2, wt_p, b_p)
    else:
        tn = _choose_div_tile(sp, 512)
        tk = _choose_div_tile(lnp, 512)
        m_tiles, n_tiles = m_pad // tm, sp // tn
        grid = (m_tiles, n_tiles, lnp // tk)
        if out_dtype == jnp.float32:
            kernel = _rou_tiled_kernel_f32
            scratch = []
            vmem_need = 2 * (tm * tk * xb + tk * tn * wb + tm * tn * ob + tn * bb)
        else:
            kernel = _rou_tiled_kernel_acc
            scratch = [pltpu.VMEM((tm, tn), jnp.float32)]
            vmem_need = (2 * (tm * tk * xb + tk * tn * wb + tm * tn * ob + tn * bb)
                         + tm * tn * 4)
        out_p = pl.pallas_call(
            kernel,
            out_shape=jax.ShapeDtypeStruct((m_pad, sp), out_dtype),
            grid_spec=pltpu.PrefetchScalarGridSpec(
                num_scalar_prefetch=0,
                grid=grid,
                in_specs=[
                    pl.BlockSpec((tm, tk), lambda i, j, k: (i, k)),   # X tile
                    pl.BlockSpec((tk, tn), lambda i, j, k: (k, j)),   # W_t tile
                    pl.BlockSpec((1, tn), lambda i, j, k: (0, j)),    # bias tile
                ],
                out_specs=pl.BlockSpec((tm, tn), lambda i, j, k: (i, j)),
                scratch_shapes=scratch,
            ),
            compiler_params=pltpu.CompilerParams(
                dimension_semantics=("parallel", "parallel", "arbitrary"),
                vmem_limit_bytes=_vmem_limit(vmem_need),
            ),
            cost_estimate=pl.CostEstimate(
                flops=2 * m_pad * lnp * sp,
                transcendentals=m_pad * sp,
                # True streamed bytes: X re-read per N tile, W per M tile.
                bytes_accessed=m_pad * lnp * xb * n_tiles
                + lnp * sp * wb * m_tiles
                + m_pad * sp * ob
                + sp * bb * m_tiles,
            ),
        )(x2, wt_p, b_p)

    return out_p[:n_rows, :s].reshape(*lead, s)


def make_rou(weight, bias):
    """Build the Rou forward: params prepared once, forward jitted once."""
    s, ln = weight.shape
    wt_p, b_p = rou_init_params(weight, bias)
    fwd = jax.jit(functools.partial(_rou_forward, ln=ln, s=s))
    return lambda x: fwd(x, wt_p, b_p)


if __name__ == "__main__":
    key = jax.random.PRNGKey(0)
    kx, kw, kb = jax.random.split(key, 3)

    # Rou(ln, s): X [N, ln], weight [s, ln], bias [s].
    N, ln, s = 384, 640, 384
    x = jax.random.normal(kx, (N, ln), dtype=jnp.float32)
    weight = jax.random.normal(kw, (s, ln), dtype=jnp.float32) * 0.1
    bias = jax.random.normal(kb, (s,), dtype=jnp.float32) * 0.1

    ref = jnp.tanh(x @ weight.T + bias)

    # 1) Weight-resident Pallas path (zero per-call padding for these shapes).
    rou = make_rou(weight, bias)
    out = jax.block_until_ready(rou(x))
    assert out.shape == (N, s)
    assert jnp.allclose(out, ref, atol=2e-5, rtol=1e-5), float(
        jnp.max(jnp.abs(out - ref))
    )

    # 2) Tiled fallback path coverage (same shapes, forced).
    wt_p, b_p = rou_init_params(weight, bias)
    out_t = jax.block_until_ready(
        _rou_forward(x, wt_p, b_p, ln=ln, s=s, force_tiled=True)
    )
    assert jnp.allclose(out_t, ref, atol=2e-5, rtol=1e-5)

    # 3) Ragged shapes: non-multiple-of-128 features / non-multiple-of-8-split
    #    rows exercise the minimal per-call K/M padding + output slicing.
    N2, ln2, s2 = 200, 300, 100
    x2 = jax.random.normal(kx, (N2, ln2), dtype=jnp.float32)
    w2 = jax.random.normal(kw, (s2, ln2), dtype=jnp.float32) * 0.1
    b2 = jax.random.normal(kb, (s2,), dtype=jnp.float32) * 0.1
    rou2 = make_rou(w2, b2)
    out2 = jax.block_until_ready(rou2(x2))
    assert jnp.allclose(out2, jnp.tanh(x2 @ w2.T + b2), atol=2e-5, rtol=1e-5)

    # 4) Tiny-shape path (fused XLA fallback, same semantics).
    xt = jax.random.normal(kx, (8, 32), dtype=jnp.float32)
    wt = jax.random.normal(kw, (16, 32), dtype=jnp.float32) * 0.1
    bt = jax.random.normal(kb, (16,), dtype=jnp.float32) * 0.1
    rou_tiny = make_rou(wt, bt)
    out_tiny = jax.block_until_ready(rou_tiny(xt))
    assert jnp.allclose(out_tiny, jnp.tanh(xt @ wt.T + bt), atol=1e-5, rtol=1e-5)

    print("KERNEL_OK")
</pallas_src>

<mosaic_0001>
module attributes {stable_mosaic.version = 11 : i64} {
  func.func @_rou_resident_kernel(%arg0: i32, %arg1: memref<192x640xf32, #tpu.memory_space<vmem>>, %arg2: memref<640x384xf32, #tpu.memory_space<vmem>>, %arg3: memref<1x384xf32, #tpu.memory_space<vmem>>, %arg4: memref<192x384xf32, #tpu.memory_space<vmem>>) attributes {dimension_semantics = [#tpu.dimension_semantics<parallel>], iteration_bounds = array<i64: 2>, scalar_prefetch = 0 : i64, scratch_operands = 0 : i64, tpu.core_type = #tpu.core_type<tc>, window_params = [{transform_indices = @transform_0, window_bounds = array<i64: 192, 640>}, {pipeline_mode = #tpu.pipeline_mode<synchronous>, transform_indices = @transform_1, window_bounds = array<i64: 640, 384>}, {pipeline_mode = #tpu.pipeline_mode<synchronous>, transform_indices = @transform_2, window_bounds = array<i64: 1, 384>}, {transform_indices = @transform_3, window_bounds = array<i64: 192, 384>}]} {
    %c0 = arith.constant 0 : index
    %c0_0 = arith.constant 0 : index
    %0 = vector.load %arg1[%c0, %c0_0] : memref<192x640xf32, #tpu.memory_space<vmem>>, vector<192x640xf32>
    %c0_1 = arith.constant 0 : index
    %c0_2 = arith.constant 0 : index
    %1 = vector.load %arg2[%c0_1, %c0_2] : memref<640x384xf32, #tpu.memory_space<vmem>>, vector<640x384xf32>
    %cst = arith.constant dense<0.000000e+00> : vector<192x384xf32>
    %2 = tpu.matmul %0, %1, %cst {dimension_numbers = #tpu.dot_dimension_numbers<[1], [0], [0], [1], [0, 0, 1, 1], [], []>} : vector<192x640xf32>, vector<640x384xf32>, vector<192x384xf32> -> vector<192x384xf32>
    %c0_3 = arith.constant 0 : index
    %c0_4 = arith.constant 0 : index
    %3 = vector.load %arg3[%c0_3, %c0_4] : memref<1x384xf32, #tpu.memory_space<vmem>>, vector<1x384xf32>
    %4 = vector.broadcast %3 : vector<1x384xf32> to vector<192x384xf32>
    %5 = arith.addf %2, %4 : vector<192x384xf32>
    %6 = math.tanh %5 : vector<192x384xf32>
    %c0_5 = arith.constant 0 : index
    %c0_6 = arith.constant 0 : index
    %7 = vector.load %arg4[%c0_5, %c0_6] : memref<192x384xf32, #tpu.memory_space<vmem>>, vector<192x384xf32>
    tpu.vector_store %arg4[%c0_5, %c0_6], %6 {strides = array<i32>} : memref<192x384xf32, #tpu.memory_space<vmem>>, vector<192x384xf32>,
    return
  }
  func.func @transform_0(%arg0: i32) -> (i32, i32) {
    %c0_i32 = arith.constant 0 : i32
    %c0_i32_0 = arith.constant 0 : i32
    return %arg0, %c0_i32 : i32, i32
  }
  func.func @transform_1(%arg0: i32) -> (i32, i32) {
    %c0_i32 = arith.constant 0 : i32
    %c0_i32_0 = arith.constant 0 : i32
    %c0_i32_1 = arith.constant 0 : i32
    return %c0_i32, %c0_i32_0 : i32, i32
  }
  func.func @transform_2(%arg0: i32) -> (i32, i32) {
    %c0_i32 = arith.constant 0 : i32
    %c0_i32_0 = arith.constant 0 : i32
    %c0_i32_1 = arith.constant 0 : i32
    return %c0_i32, %c0_i32_0 : i32, i32
  }
  func.func @transform_3(%arg0: i32) -> (i32, i32) {
    %c0_i32 = arith.constant 0 : i32
    %c0_i32_0 = arith.constant 0 : i32
    return %arg0, %c0_i32 : i32, i32
  }
}

</mosaic_0001>

<bundles_post_ra>
// kernel: _rou_forward.1
= control target key start
LH: loop header
LB: loop body
LE: loop exit
PB: predicated region body
PF: predicated region fallthrough
CT: control target
= control target key end

     0   :  { %8 = vsyncpa [#allocation3], 0  ;;  %s3648_s0 = inlined_call_operand.hbm [shape: f32[384,640], index: 0, kind: input, shape index: {}]   ;;  %s3649_s1 = inlined_call_operand.hbm [shape: f32[640,384], index: 1, kind: input, shape index: {}]   ;;  %s3650_s2 = inlined_call_operand.vmem [shape: f32[1,384], index: 2, kind: input, shape index: {}]   ;;  %s3651_s3 = inlined_call_operand.hbm [shape: f32[384,384], index: 3, kind: output, shape index: {}]  }
   0x1   :  { %10 = vsyncpa [#allocation3 + $0x1], 0 }
   0x2   :  { %11 = vsyncpa [#allocation6], 0 }
   0x3   :  { %12 = vsyncpa [#allocation4], 0 }
   0x4   :  { %14 = vsyncpa [#allocation4 + $0x1], 0  ;;  %s2544_s12 = smov 0   ;;  %s2546_s13 = smov 0  }
   0x5   :  { %s2548_s14 = smov 0   ;;  %s2550_s15 = smov 0  }
   0x6 LB: > { %s2565_s16 = sadd.s32 4294967295, %s2512_s15   ;;  %s2008_s17 = sadd.s32 4294967294, %s2512_s15   ;;  %s2512_s15 = sphi %s2550_s15, %s3673_s15   ;;  %s2508_s14 = sphi %s2548_s14, %s3672_s14   ;;  %s2504_s13 = sphi %s2546_s13, %s3671_s13   ;;  %s2500_s12 = sphi %s2544_s12, %s3670_s12  }
   0x7   : > { %p40_p0 = scmp.ne.s32.totalorder %s2504_s13, %s2500_s12  ;;  %p3652_p1 = scmp.eq.s32.totalorder %s2565_s16, 0 }
   0x8   : > { %p112_p3 = scmp.eq.s32.totalorder %s2008_s17, 1  ;;  %p2009_p5 = scmp.ge.s32.totalorder %s2512_s15, 1 }
   0x9   : > { %p2574_p4 = por %p3652_p1, %p40_p0  ;;  %p119_p7 = scmp.lt.s32.totalorder %s2512_s15, 3 }
   0xa   : > { %p2579_p6 = por %p112_p3, %p40_p0  ;;  %s2514_s21 = smov [#allocation5]  }
   0xb   : > { %s3656_s18 = scalar_select %p2574_p4, 1, 0 }
   0xc   : > { %s3657_s19 = scalar_select %p2579_p6, 1, 0 }
   0xd   : > { %p2584_p8 = pnand %p2009_p5, %p119_p7  ;;  %s131_s22 = sshll.u32 %s2514_s21, 4  ;;  %s132_s22 = int_to_ptr.vmem [resolvable:$true] %s131_s22 }
   0xe   : > { %s2598_s24 = sadd.s32 1, %s2512_s15   ;;  %s2401_s26 = scalar_lea.vmem %s132_s22, 30720 }
   0xf   : > { %s3658_s20 = scalar_select %p2584_p8, 1, 0 }
  0x10   : > { %p2139_p9 = pneg %p2584_p8  ;;  %s24_s25 = ssub.s32 %s2512_s15, %s2598_s24 }
  0x11   : > { %p2402_p13 = scmp.ne.s32.totalorder %s132_s22, %s2401_s26  ;;  %p2409_p5 = scmp.lt.s32.totalorder %s132_s22, %s132_s22 }
  0x12   : > { %p2593_p11 = pnand %p2139_p9, %p3652_p1  ;;  %p2410_p7 = scmp.lt.s32.totalorder %s2401_s26, %s2401_s26 }
  0x14   : > { %p2392_p12 = pneg %p2593_p11  ;;  %p2411_p2 = por %p2410_p7, %p2409_p5 }
  0x16   : > { %p2404_p0 = pnand %p2402_p13, %p2392_p12 }
  0x18   : > { %p2405_p3 = pneg %p2404_p0 }
  0x1a   : > { %p2412_p10 = pnand %p2411_p2, %p2405_p3 }
  0x1c   : > { %2415 = shalt.err (!%p2412_p10)
}
  0x1d   : > { %s2515_s27 = smov 384   ;;  %s2516_s28 = smov 24  }
  0x1e   : > { %2142 = dma.hbm_to_vmem [thread:$0]  (!%p2593_p11), %s3649_s1, 30720, %s132_s22, [#allocation6], %s2515_s27, %s2515_s27, %s2516_s28  }
  0x1f   : > { %p25_p9 = scmp.eq.s32.totalorder %s24_s25, 0  ;;  %s27_s4 = sadd.s32 1, %s2508_s14 }
  0x20   : > { %p34_p2 = scmp.ne.s32.totalorder %s2508_s14, %s2504_s13  ;;  %p35_p10 = scmp.eq.s32.totalorder %s2512_s15, 0 }
  0x21   : > { %s2614_s5 = scalar_select %p25_p9, %s2508_s14, %s27_s4  }
  0x22   : > { %p36_p12 = por %p35_p10, %p34_p2  ;;  %p3660_p13 = scmp.eq.s32.totalorder %s2565_s16, 1 }
  0x23   : > { %p2152_p3 = scmp.lt.s32.totalorder %s2512_s15, 2  ;;  %s148_s7 = sand.u32 1, %s2508_s14  }
  0x24   : > { %p2618_p0 = por %p3660_p13, %p34_p2  ;;  %s2126_s8 = smul.u32 960, %s148_s7 }
  0x25   : > { %s2153_s9 = smul.u32 15360, %s2512_s15  ;;  %p2625_p5 = pnand %p2152_p3, %p36_p12 }
  0x26   : > { %s3661_s6 = scalar_select %p2618_p0, 1, 0 }
  0x27   : > { %s2632_s21 = scalar_lea.hbm %s3648_s0, %s2153_s9  ;;  %s152_s22 = scalar_lea.vmem [#allocation2], %s2126_s8 }
  0x28   : > { %s160_s23 = sshll.u32 %s152_s22, 4  ;;  %s2636_s25 = scalar_lea.sflag [#allocation3], %s148_s7  ;;  %s2634_s23 = int_to_ptr.vmem [resolvable:$true] %s160_s23 }
  0x29   : > { %s2416_s26 = scalar_lea.hbm %s2632_s21, 15360  ;;  %p2418_p7 = pneg %p2625_p5 }
  0x2a   : > { %p2417_p11 = scmp.ne.s32.totalorder %s2632_s21, %s2416_s26  ;;  %s2421_s29 = scalar_lea.hbm %s3648_s0, 30720 }
  0x2b   : > { %p2422_p10 = scmp.lt.s32.totalorder %s2632_s21, %s3648_s0  ;;  %p2423_p12 = scmp.lt.s32.totalorder %s2421_s29, %s2416_s26 }
  0x2c   : > { %p2419_p9 = pnand %p2418_p7, %p2417_p11 }
  0x2d   : > { %p2424_p13 = por %p2423_p12, %p2422_p10 }
  0x2e   : > { %p2420_p2 = pneg %p2419_p9 }
  0x30   : > { %p2425_p3 = pnand %p2424_p13, %p2420_p2 }
  0x32   : > { %2428 = shalt.err (!%p2425_p3)
}
  0x33   : > { %s2429_s7 = scalar_lea.vmem %s2634_s23, 15360  ;;  %s2517_s8 = smov [#allocation2]  }
  0x34   : > { %p2430_p1 = scmp.ne.s32.totalorder %s2634_s23, %s2429_s7  ;;  %s2434_s9 = sshll.u32 %s2517_s8, 4  ;;  %s2435_s9 = int_to_ptr.vmem [resolvable:$false] %s2434_s9 }
  0x35   : > { %s2436_s11 = scalar_lea.vmem %s2435_s9, 30720  ;;  %p2437_p9 = scmp.lt.s32.totalorder %s2634_s23, %s2435_s9 }
  0x36   : > { %p2432_p6 = pnand %p2430_p1, %p2418_p7  ;;  %p2438_p0 = scmp.lt.s32.totalorder %s2436_s11, %s2429_s7 }
  0x38   : > { %p2433_p11 = pneg %p2432_p6  ;;  %p2439_p4 = por %p2438_p0, %p2437_p9 }
  0x3a   : > { %p2440_p8 = pnand %p2439_p4, %p2433_p11 }
  0x3c   : > { %2443 = shalt.err (!%p2440_p8)
}
  0x3d   : > { %s2518_s17 = smov 640   ;;  %s2519_s22 = smov 40  }
  0x3e   : > { %2146 = dma.hbm_to_vmem [thread:$0]  (!%p2625_p5), %s2632_s21, 15360, %s2634_s23, %s2636_s25, %s2518_s17, %s2518_s17, %s2519_s22  }
  0x3f   : > { %p3663_p1 = scmp.ne.s32.totalorder %s3658_s20, 0 }
  0x40   : > { %s2660_s26 = sand.u32 (!%p3663_p1), 1, %s2504_s13   ;;  %p3664_p4 = scmp.ne.s32.totalorder (!%p3663_p1), %s3656_s18, 0 }
  0x41   : > { %172 = sbr.rel (%p3663_p1) target bundleno = 650 (0x28a), region = 32  ;;  %s175_s28 = scalar_lea.sflag (!%p3663_p1), [#allocation3], %s2660_s26 }
  0x42   : > { %s2128_s27 = smul.u32 (!%p3663_p1), 960, %s2660_s26 }
  0x44   : > { %s2664_s29 = scalar_lea.vmem (!%p3663_p1), [#allocation2], %s2128_s27 }
  0x46   : > { %2487 = dma.done.wait (%p3664_p4), %s175_s28, 15360  }
  0x47   : > { %2489 = vsyncadd (%p3664_p4), %s175_s28, 4294951936  ;;  %p3665_p6 = scmp.eq.s32.totalorder %s2565_s16, 0 }
  0x49   : > { %2491 = dma.done.wait (%p3665_p6), [#allocation6], 30720   ;;  %p3666_p8 = pmov %p3665_p6 }
  0x4a   : > { %v373_v0 = vld [vmem:[#allocation5 + $0x170] sm:$0xff]  ;;  %v372_v2 = vld [vmem:[#allocation5 + $0x168] sm:$0xff]  ;;  %v370_v4 = vld [vmem:[#allocation5 + $0x158] sm:$0xff]  ;;  %s2129_s10 = smul.u32 576, %s2660_s26  ;;  %s1911_s11 = scalar_lea.sflag [#allocation4], %s2660_s26 }
  0x4b   : > { %2493 = vsyncadd (%p3666_p8), [#allocation6], 4294936576  ;;  %v469_v1 = vld [vmem:[#allocation5 + $0x470] sm:$0xff]  ;;  %584 = vmatprep.subr.mxu0 %v373_v0  ;;  %v468_v3 = vld [vmem:[#allocation5 + $0x468] sm:$0xff]  ;;  %s2155_s30 = smul.u32 9216, %s2565_s16  ;;  %p3667_p5 = scmp.ne.s32.totalorder %s3661_s6, 0 }
  0x4c   : > { %793 = vmatprep.subr.mxu1 %v469_v1  ;;  %v466_v5 = vld [vmem:[#allocation5 + $0x458] sm:$0xff]  ;;  %585 = vmatpush1.msra.mxu0 %v372_v2  ;;  %v369_v6 = vld [vmem:[#allocation5 + $0x150] sm:$0xff]  ;;  %v367_v8 = vld [vmem:[#allocation5 + $0x140] sm:$0xff]  ;;  %s3390_s21 = scalar_lea.vmem [#allocation7], %s2129_s10  ;;  %s2521_s16 = smov [#allocation7]  }
  0x4d   : > { %794 = vmatpush1.msra.mxu1 %v468_v3  ;;  %v465_v7 = vld [vmem:[#allocation5 + $0x450] sm:$0xff]  ;;  %586 = vmatprep.subr.mxu0 %v370_v4  ;;  %v463_v9 = vld [vmem:[#allocation5 + $0x440] sm:$0xff]  ;;  %v366_v10 = vld [vmem:[#allocation5 + $0x138] sm:$0xff]  ;;  %s1925_s4 = sshll.u32 %s3390_s21, 4  ;;  %s3602_s9 = scalar_lea.hbm %s3651_s3, %s2155_s30  ;;  %s3604_s4 = int_to_ptr.vmem [resolvable:$true] %s1925_s4 }
  0x4e   : > { %795 = vmatprep.subr.mxu1 %v466_v5  ;;  %v462_v11 = vld [vmem:[#allocation5 + $0x438] sm:$0xff]  ;;  %587 = vmatpush1.msra.mxu0 %v369_v6  ;;  %v364_v12 = vld [vmem:[#allocation5 + $0x128] sm:$0xff]  ;;  %v363_v14 = vld [vmem:[#allocation5 + $0x120] sm:$0xff]  ;;  %s2444_s17 = scalar_lea.vmem %s3604_s4, 9216  ;;  %s2448_s22 = sshll.u32 %s2521_s16, 4  ;;  %s2449_s22 = int_to_ptr.vmem [resolvable:$false] %s2448_s22 }
  0x4f   : > { %796 = vmatpush1.msra.mxu1 %v465_v7  ;;  %v460_v13 = vld [vmem:[#allocation5 + $0x428] sm:$0xff]  ;;  %588 = vmatprep.subr.mxu0 %v367_v8  ;;  %v459_v15 = vld [vmem:[#allocation5 + $0x420] sm:$0xff]  ;;  %v361_v16 = vld [vmem:[#allocation5 + $0x110] sm:$0xff]  ;;  %p2445_p0 = scmp.ne.s32.totalorder %s3604_s4, %s2444_s17  ;;  %s2450_s27 = scalar_lea.vmem %s2449_s22, 18432 }
  0x50   : > { %797 = vmatprep.subr.mxu1 %v463_v9  ;;  %589 = vmatpush1.msra.mxu0 %v366_v10  ;;  %v457_v17 = vld [vmem:[#allocation5 + $0x410] sm:$0xff]  ;;  %v360_v18 = vld [vmem:[#allocation5 + $0x108] sm:$0xff]  ;;  %v358_v20 = vld [vmem:[#allocation5 + $0xf8] sm:$0xff]  ;;  %p2451_p10 = scmp.lt.s32.totalorder %s3604_s4, %s2449_s22  ;;  %p2452_p12 = scmp.lt.s32.totalorder %s2450_s27, %s2444_s17 }
  0x51   : > { %798 = vmatpush1.msra.mxu1 %v462_v11  ;;  %590 = vmatprep.subr.mxu0 %v364_v12  ;;  %v456_v19 = vld [vmem:[#allocation5 + $0x408] sm:$0xff]  ;;  %v454_v21 = vld [vmem:[#allocation5 + $0x3f8] sm:$0xff]  ;;  %v357_v22 = vld [vmem:[#allocation5 + $0xf0] sm:$0xff]  ;;  %p2446_p7 = pnand %p2445_p0, %p3667_p5 }
  0x52   : > { %799 = vmatprep.subr.mxu1 %v460_v13  ;;  %591 = vmatpush1.msra.mxu0 %v363_v14  ;;  %v453_v23 = vld [vmem:[#allocation5 + $0x3f0] sm:$0xff]  ;;  %v355_v24 = vld [vmem:[#allocation5 + $0xe0] sm:$0xff]  ;;  %v354_v26 = vld [vmem:[#allocation5 + $0xd8] sm:$0xff]  ;;  %p2453_p13 = por %p2452_p12, %p2451_p10 }
  0x53   : > { %800 = vmatpush1.msra.mxu1 %v459_v15  ;;  %592 = vmatprep.subr.mxu0 %v361_v16  ;;  %v451_v25 = vld [vmem:[#allocation5 + $0x3e0] sm:$0xff]  ;;  %v450_v27 = vld [vmem:[#allocation5 + $0x3d8] sm:$0xff]  ;;  %v352_v28 = vld [vmem:[#allocation5 + $0xc8] sm:$0xff]  ;;  %p2447_p2 = pneg %p2446_p7 }
  0x54   : > { %801 = vmatprep.subr.mxu1 %v457_v17  ;;  %593 = vmatpush1.msra.mxu0 %v360_v18  ;;  %v448_v29 = vld [vmem:[#allocation5 + $0x3c8] sm:$0xff]  ;;  %v351_v30 = vld [vmem:[#allocation5 + $0xc0] sm:$0xff]  ;;  %v349_v32 = vld [vmem:[#allocation5 + $0xb0] sm:$0xff] }
  0x55   : > { %802 = vmatpush1.msra.mxu1 %v456_v19  ;;  %594 = vmatprep.subr.mxu0 %v358_v20  ;;  %v447_v31 = vld [vmem:[#allocation5 + $0x3c0] sm:$0xff]  ;;  %v445_v33 = vld [vmem:[#allocation5 + $0x3b0] sm:$0xff]  ;;  %v348_v34 = vld [vmem:[#allocation5 + $0xa8] sm:$0xff]  ;;  %p2454_p3 = pnand %p2453_p13, %p2447_p2 }
  0x56   : > { %803 = vmatprep.subr.mxu1 %v454_v21  ;;  %595 = vmatpush1.msra.mxu0 %v357_v22  ;;  %v444_v35 = vld [vmem:[#allocation5 + $0x3a8] sm:$0xff]  ;;  %v346_v36 = vld [vmem:[#allocation5 + $0x98] sm:$0xff]  ;;  %v345_v38 = vld [vmem:[#allocation5 + $0x90] sm:$0xff] }
  0x57   : > { %804 = vmatpush1.msra.mxu1 %v453_v23  ;;  %596 = vmatprep.subr.mxu0 %v355_v24  ;;  %v442_v37 = vld [vmem:[#allocation5 + $0x398] sm:$0xff]  ;;  %v441_v39 = vld [vmem:[#allocation5 + $0x390] sm:$0xff]  ;;  %v343_v40 = vld [vmem:[#allocation5 + $0x80] sm:$0xff] }
  0x58   : > { %805 = vmatprep.subr.mxu1 %v451_v25  ;;  %597 = vmatpush1.msra.mxu0 %v354_v26  ;;  %v439_v41 = vld [vmem:[#allocation5 + $0x380] sm:$0xff]  ;;  %v342_v42 = vld [vmem:[#allocation5 + $0x78] sm:$0xff]  ;;  %v340_v44 = vld [vmem:[#allocation5 + $0x68] sm:$0xff] }
  0x59   : > { %806 = vmatpush1.msra.mxu1 %v450_v27  ;;  %598 = vmatprep.subr.mxu0 %v352_v28  ;;  %v438_v43 = vld [vmem:[#allocation5 + $0x378] sm:$0xff]  ;;  %v436_v45 = vld [vmem:[#allocation5 + $0x368] sm:$0xff]  ;;  %v339_v46 = vld [vmem:[#allocation5 + $0x60] sm:$0xff] }
  0x5a   : > { %807 = vmatprep.subr.mxu1 %v448_v29  ;;  %599 = vmatpush1.msra.mxu0 %v351_v30  ;;  %v435_v47 = vld [vmem:[#allocation5 + $0x360] sm:$0xff]  ;;  %v337_v48 = vld [vmem:[#allocation5 + $0x50] sm:$0xff]  ;;  %v336_v50 = vld [vmem:[#allocation5 + $0x48] sm:$0xff] }
  0x5b   : > { %808 = vmatpush1.msra.mxu1 %v447_v31  ;;  %600 = vmatprep.subr.mxu0 %v349_v32  ;;  %v433_v49 = vld [vmem:[#allocation5 + $0x350] sm:$0xff]  ;;  %v432_v51 = vld [vmem:[#allocation5 + $0x348] sm:$0xff]  ;;  %v334_v52 = vld [vmem:[#allocation5 + $0x38] sm:$0xff] }
  0x5c   : > { %809 = vmatprep.subr.mxu1 %v445_v33  ;;  %601 = vmatpush1.msra.mxu0 %v348_v34  ;;  %v430_v53 = vld [vmem:[#allocation5 + $0x338] sm:$0xff]  ;;  %v333_v54 = vld [vmem:[#allocation5 + $0x30] sm:$0xff]  ;;  %v331_v56 = vld [vmem:[#allocation5 + $0x20] sm:$0xff] }
  0x5d   : > { %810 = vmatpush1.msra.mxu1 %v444_v35  ;;  %602 = vmatprep.subr.mxu0 %v346_v36  ;;  %v429_v55 = vld [vmem:[#allocation5 + $0x330] sm:$0xff]  ;;  %v427_v57 = vld [vmem:[#allocation5 + $0x320] sm:$0xff]  ;;  %v330_v58 = vld [vmem:[#allocation5 + $0x18] sm:$0xff] }
  0x5e   : > { %811 = vmatprep.subr.mxu1 %v442_v37  ;;  %603 = vmatpush1.msra.mxu0 %v345_v38  ;;  %v426_v59 = vld [vmem:[#allocation5 + $0x318] sm:$0xff]  ;;  %v328_v60 = vld [vmem:[#allocation5 + $0x8] sm:$0xff]  ;;  %v327_v62 = vld [vmem:[#allocation5] sm:$0xff] }
  0x5f   : > { %812 = vmatpush1.msra.mxu1 %v441_v39  ;;  %604 = vmatprep.subr.mxu0 %v343_v40  ;;  %v424_v61 = vld [vmem:[#allocation5 + $0x308] sm:$0xff]  ;;  %v423_v63 = vld [vmem:[#allocation5 + $0x300] sm:$0xff]  ;;  %v421_v0 = vld [vmem:[#allocation5 + $0x2f0] sm:$0xff] }
  0x60   : > { %813 = vmatprep.subr.mxu1 %v439_v41  ;;  %605 = vmatpush1.msra.mxu0 %v342_v42  ;;  %v517_v1 = vld [vmem:[#allocation5 + $0x5f0] sm:$0xff]  ;;  %v420_v2 = vld [vmem:[#allocation5 + $0x2e8] sm:$0xff]  ;;  %v418_v4 = vld [vmem:[#allocation5 + $0x2d8] sm:$0xff] }
  0x61   : > { %814 = vmatpush1.msra.mxu1 %v438_v43  ;;  %606 = vmatprep.subr.mxu0 %v340_v44  ;;  %v516_v3 = vld [vmem:[#allocation5 + $0x5e8] sm:$0xff]  ;;  %v514_v5 = vld [vmem:[#allocation5 + $0x5d8] sm:$0xff]  ;;  %v417_v6 = vld [vmem:[#allocation5 + $0x2d0] sm:$0xff] }
  0x62   : > { %815 = vmatprep.subr.mxu1 %v436_v45  ;;  %607 = vmatpush1.msra.mxu0 %v339_v46  ;;  %v513_v7 = vld [vmem:[#allocation5 + $0x5d0] sm:$0xff]  ;;  %v415_v8 = vld [vmem:[#allocation5 + $0x2c0] sm:$0xff]  ;;  %v414_v10 = vld [vmem:[#allocation5 + $0x2b8] sm:$0xff] }
  0x63   : > { %816 = vmatpush1.msra.mxu1 %v435_v47  ;;  %608 = vmatprep.subr.mxu0 %v337_v48  ;;  %v511_v9 = vld [vmem:[#allocation5 + $0x5c0] sm:$0xff]  ;;  %v510_v11 = vld [vmem:[#allocation5 + $0x5b8] sm:$0xff]  ;;  %v412_v12 = vld [vmem:[#allocation5 + $0x2a8] sm:$0xff] }
  0x64   : > { %817 = vmatprep.subr.mxu1 %v433_v49  ;;  %609 = vmatpush1.msra.mxu0 %v336_v50  ;;  %v508_v13 = vld [vmem:[#allocation5 + $0x5a8] sm:$0xff]  ;;  %v411_v14 = vld [vmem:[#allocation5 + $0x2a0] sm:$0xff]  ;;  %v409_v16 = vld [vmem:[#allocation5 + $0x290] sm:$0xff] }
  0x65   : > { %818 = vmatpush1.msra.mxu1 %v432_v51  ;;  %610 = vmatprep.subr.mxu0 %v334_v52  ;;  %v507_v15 = vld [vmem:[#allocation5 + $0x5a0] sm:$0xff]  ;;  %v505_v17 = vld [vmem:[#allocation5 + $0x590] sm:$0xff]  ;;  %v408_v18 = vld [vmem:[#allocation5 + $0x288] sm:$0xff] }
  0x66   : > { %819 = vmatprep.subr.mxu1 %v430_v53  ;;  %611 = vmatpush1.msra.mxu0 %v333_v54  ;;  %v504_v19 = vld [vmem:[#allocation5 + $0x588] sm:$0xff]  ;;  %v406_v20 = vld [vmem:[#allocation5 + $0x278] sm:$0xff]  ;;  %v405_v22 = vld [vmem:[#allocation5 + $0x270] sm:$0xff] }
  0x67   : > { %820 = vmatpush1.msra.mxu1 %v429_v55  ;;  %612 = vmatprep.subr.mxu0 %v331_v56  ;;  %v502_v21 = vld [vmem:[#allocation5 + $0x578] sm:$0xff]  ;;  %v501_v23 = vld [vmem:[#allocation5 + $0x570] sm:$0xff]  ;;  %v403_v24 = vld [vmem:[#allocation5 + $0x260] sm:$0xff] }
  0x68   : > { %821 = vmatprep.subr.mxu1 %v427_v57  ;;  %613 = vmatpush1.msra.mxu0 %v330_v58  ;;  %v499_v25 = vld [vmem:[#allocation5 + $0x560] sm:$0xff]  ;;  %v402_v26 = vld [vmem:[#allocation5 + $0x258] sm:$0xff]  ;;  %v400_v28 = vld [vmem:[#allocation5 + $0x248] sm:$0xff] }
  0x69   : > { %822 = vmatpush1.msra.mxu1 %v426_v59  ;;  %614 = vmatprep.subr.mxu0 %v328_v60  ;;  %v498_v27 = vld [vmem:[#allocation5 + $0x558] sm:$0xff]  ;;  %v496_v29 = vld [vmem:[#allocation5 + $0x548] sm:$0xff]  ;;  %v399_v30 = vld [vmem:[#allocation5 + $0x240] sm:$0xff] }
  0x6a   : > { %823 = vmatprep.subr.mxu1 %v424_v61  ;;  %615 = vmatpush1.msra.mxu0 %v327_v62  ;;  %v495_v31 = vld [vmem:[#allocation5 + $0x540] sm:$0xff]  ;;  %v397_v32 = vld [vmem:[#allocation5 + $0x230] sm:$0xff]  ;;  %v396_v34 = vld [vmem:[#allocation5 + $0x228] sm:$0xff] }
  0x6b   : > { %824 = vmatpush1.msra.mxu1 %v423_v63  ;;  %616 = vmatprep.subr.mxu0 %v421_v0  ;;  %v493_v33 = vld [vmem:[#allocation5 + $0x530] sm:$0xff]  ;;  %v492_v35 = vld [vmem:[#allocation5 + $0x528] sm:$0xff]  ;;  %v394_v36 = vld [vmem:[#allocation5 + $0x218] sm:$0xff] }
  0x6c   : > { %825 = vmatprep.subr.mxu1 %v517_v1  ;;  %617 = vmatpush2.msra.mxu0 %v420_v2  ;;  %v490_v37 = vld [vmem:[#allocation5 + $0x518] sm:$0xff]  ;;  %v393_v38 = vld [vmem:[#allocation5 + $0x210] sm:$0xff]  ;;  %v391_v40 = vld [vmem:[#allocation5 + $0x200] sm:$0xff] }
  0x6d   : > { %826 = vmatpush2.msra.mxu1 %v516_v3  ;;  %618 = vmatprep.subr.mxu0 %v418_v4  ;;  %v489_v39 = vld [vmem:[#allocation5 + $0x510] sm:$0xff]  ;;  %v487_v41 = vld [vmem:[#allocation5 + $0x500] sm:$0xff]  ;;  %v390_v42 = vld [vmem:[#allocation5 + $0x1f8] sm:$0xff] }
  0x6e   : > { %827 = vmatprep.subr.mxu1 %v514_v5  ;;  %619 = vmatpush2.msra.mxu0 %v417_v6  ;;  %v486_v43 = vld [vmem:[#allocation5 + $0x4f8] sm:$0xff]  ;;  %v388_v44 = vld [vmem:[#allocation5 + $0x1e8] sm:$0xff]  ;;  %v387_v46 = vld [vmem:[#allocation5 + $0x1e0] sm:$0xff] }
  0x6f   : > { %828 = vmatpush2.msra.mxu1 %v513_v7  ;;  %620 = vmatprep.subr.mxu0 %v415_v8  ;;  %v484_v45 = vld [vmem:[#allocation5 + $0x4e8] sm:$0xff]  ;;  %v483_v47 = vld [vmem:[#allocation5 + $0x4e0] sm:$0xff]  ;;  %v385_v48 = vld [vmem:[#allocation5 + $0x1d0] sm:$0xff] }
  0x70   : > { %829 = vmatprep.subr.mxu1 %v511_v9  ;;  %621 = vmatpush2.msra.mxu0 %v414_v10  ;;  %v481_v49 = vld [vmem:[#allocation5 + $0x4d0] sm:$0xff]  ;;  %v384_v50 = vld [vmem:[#allocation5 + $0x1c8] sm:$0xff]  ;;  %v382_v52 = vld [vmem:[#allocation5 + $0x1b8] sm:$0xff] }
  0x71   : > { %830 = vmatpush2.msra.mxu1 %v510_v11  ;;  %622 = vmatprep.subr.mxu0 %v412_v12  ;;  %v480_v51 = vld [vmem:[#allocation5 + $0x4c8] sm:$0xff]  ;;  %v478_v53 = vld [vmem:[#allocation5 + $0x4b8] sm:$0xff]  ;;  %v381_v54 = vld [vmem:[#allocation5 + $0x1b0] sm:$0xff] }
  0x72   : > { %831 = vmatprep.subr.mxu1 %v508_v13  ;;  %623 = vmatpush2.msra.mxu0 %v411_v14  ;;  %v477_v55 = vld [vmem:[#allocation5 + $0x4b0] sm:$0xff]  ;;  %v379_v56 = vld [vmem:[#allocation5 + $0x1a0] sm:$0xff]  ;;  %v378_v58 = vld [vmem:[#allocation5 + $0x198] sm:$0xff]  ;;  %v2520_v14 = vmov 0.0  }
  0x73   : > { %832 = vmatpush2.msra.mxu1 %v507_v15  ;;  %624 = vmatprep.subr.mxu0 %v409_v16  ;;  %v475_v57 = vld [vmem:[#allocation5 + $0x4a0] sm:$0xff]  ;;  %v474_v59 = vld [vmem:[#allocation5 + $0x498] sm:$0xff]  ;;  %v376_v60 = vld [vmem:[#allocation5 + $0x188] sm:$0xff] }
  0x74   : > { %833 = vmatprep.subr.mxu1 %v505_v17  ;;  %625 = vmatpush2.msra.mxu0 %v408_v18  ;;  %v472_v61 = vld [vmem:[#allocation5 + $0x488] sm:$0xff]  ;;  %v375_v62 = vld [vmem:[#allocation5 + $0x180] sm:$0xff]  ;;  %v210_v1 = vld [vmem:[%s2664_s29 + $0x18] sm:$0xff] }
  0x75   : > { %834 = vmatpush2.msra.mxu1 %v504_v19  ;;  %626 = vmatprep.subr.mxu0 %v406_v20  ;;  %v2675_v63 = vld [vmem:[%s2664_s29 + $0x8] sm:$0xff]  ;;  %v471_v0 = vld [vmem:[#allocation5 + $0x480] sm:$0xff]  ;;  %v209_v3 = vld [vmem:[%s2664_s29 + $0x10] sm:$0xff] }
  0x76   : > { %835 = vmatprep.subr.mxu1 %v502_v21  ;;  %627 = vmatpush2.msra.mxu0 %v405_v22  ;;  %v2679_v2 = vld [vmem:[%s2664_s29] sm:$0xff]  ;;  %v565_v4 = vld [vmem:[#allocation5 + $0x770] sm:$0xff]  ;;  %v564_v6 = vld [vmem:[#allocation5 + $0x768] sm:$0xff] }
  0x77   : > { %836 = vmatpush2.msra.mxu1 %v501_v23  ;;  %628 = vmatprep.subr.mxu0 %v403_v24  ;;  %v2684_v5 = vld [vmem:[%s2664_s29 + $0x30] sm:$0xff]  ;;  %v215_v7 = vld [vmem:[%s2664_s29 + $0x40] sm:$0xff]  ;;  %v562_v8 = vld [vmem:[#allocation5 + $0x758] sm:$0xff] }
  0x78   : > { %837 = vmatprep.subr.mxu1 %v499_v25  ;;  %629 = vmatpush2.msra.mxu0 %v402_v26  ;;  %v2690_v9 = vld [vmem:[%s2664_s29 + $0x28] sm:$0xff]  ;;  %v214_v10 = vld [vmem:[%s2664_s29 + $0x38] sm:$0xff]  ;;  %v561_v13 = vld [vmem:[#allocation5 + $0x750] sm:$0xff] }
  0x79   : > { %838 = vmatpush2.msra.mxu1 %v498_v27  ;;  %630 = vmatprep.subr.mxu0 %v400_v28  ;;  %v2694_v11 = vld [vmem:[%s2664_s29 + $0x58] sm:$0xff]  ;;  %v220_v12 = vld [vmem:[%s2664_s29 + $0x68] sm:$0xff]  ;;  %v559_v16 = vld [vmem:[#allocation5 + $0x740] sm:$0xff] }
  0x7a   : > { %839 = vmatprep.subr.mxu1 %v496_v29  ;;  %631 = vmatpush2.msra.mxu0 %v399_v30  ;;  %v374_v15 = vld [vmem:[#allocation5 + $0x178] sm:$0xff]  ;;  %v2701_v17 = vld [vmem:[%s2664_s29 + $0x50] sm:$0xff]  ;;  %v219_v18 = vld [vmem:[%s2664_s29 + $0x60] sm:$0xff] }
  0x7b   : > { %840 = vmatpush2.msra.mxu1 %v495_v31  ;;  %632 = vmatprep.subr.mxu0 %v397_v32  ;;  %v2705_v19 = vld [vmem:[%s2664_s29 + $0x80] sm:$0xff]  ;;  %v225_v20 = vld [vmem:[%s2664_s29 + $0x90] sm:$0xff]  ;;  %v558_v21 = vld [vmem:[#allocation5 + $0x738] sm:$0xff] }
  0x7c   : > { %841 = vmatprep.subr.mxu1 %v493_v33  ;;  %633 = vmatpush2.msra.mxu0 %v396_v34  ;;  %v371_v22 = vld [vmem:[#allocation5 + $0x160] sm:$0xff]  ;;  %v556_v23 = vld [vmem:[#allocation5 + $0x728] sm:$0xff]  ;;  %v2712_v24 = vld [vmem:[%s2664_s29 + $0x78] sm:$0xff] }
  0x7d   : > { %842 = vmatpush2.msra.mxu1 %v492_v35  ;;  %634 = vmatprep.subr.mxu0 %v394_v36  ;;  %v224_v25 = vld [vmem:[%s2664_s29 + $0x88] sm:$0xff]  ;;  %v230_v27 = vld [vmem:[%s2664_s29 + $0xb8] sm:$0xff]  ;;  %v555_v28 = vld [vmem:[#allocation5 + $0x720] sm:$0xff] }
  0x7e   : > { %843 = vmatprep.subr.mxu1 %v490_v37  ;;  %635 = vmatpush2.msra.mxu0 %v393_v38  ;;  %v2716_v26 = vld [vmem:[%s2664_s29 + $0xa8] sm:$0xff]  ;;  %v553_v30 = vld [vmem:[#allocation5 + $0x710] sm:$0xff]  ;;  %v2723_v31 = vld [vmem:[%s2664_s29 + $0xa0] sm:$0xff] }
  0x7f   : > { %844 = vmatpush2.msra.mxu1 %v489_v39  ;;  %636 = vmatprep.subr.mxu0 %v391_v40  ;;  %v368_v29 = vld [vmem:[#allocation5 + $0x148] sm:$0xff]  ;;  %v229_v32 = vld [vmem:[%s2664_s29 + $0xb0] sm:$0xff]  ;;  %v235_v34 = vld [vmem:[%s2664_s29 + $0xe0] sm:$0xff] }
  0x80   : > { %845 = vmatprep.subr.mxu1 %v487_v41  ;;  %637 = vmatpush2.msra.mxu0 %v390_v42  ;;  %v2727_v33 = vld [vmem:[%s2664_s29 + $0xd0] sm:$0xff]  ;;  %v552_v35 = vld [vmem:[#allocation5 + $0x708] sm:$0xff]  ;;  %v550_v37 = vld [vmem:[#allocation5 + $0x6f8] sm:$0xff] }
  0x81   : > { %846 = vmatpush2.msra.mxu1 %v486_v43  ;;  %638 = vmatprep.subr.mxu0 %v388_v44  ;;  %v365_v36 = vld [vmem:[#allocation5 + $0x130] sm:$0xff]  ;;  %v2734_v38 = vld [vmem:[%s2664_s29 + $0xc8] sm:$0xff]  ;;  %v234_v39 = vld [vmem:[%s2664_s29 + $0xd8] sm:$0xff] }
  0x82   : > { %847 = vmatprep.subr.mxu1 %v484_v45  ;;  %639 = vmatpush2.msra.mxu0 %v387_v46  ;;  %v2738_v40 = vld [vmem:[%s2664_s29 + $0xf8] sm:$0xff]  ;;  %v240_v41 = vld [vmem:[%s2664_s29 + $0x108] sm:$0xff]  ;;  %v549_v42 = vld [vmem:[#allocation5 + $0x6f0] sm:$0xff] }
  0x83   : > { %848 = vmatpush2.msra.mxu1 %v483_v47  ;;  %640 = vmatprep.subr.mxu0 %v385_v48  ;;  %v362_v43 = vld [vmem:[#allocation5 + $0x118] sm:$0xff]  ;;  %v547_v44 = vld [vmem:[#allocation5 + $0x6e0] sm:$0xff]  ;;  %v2745_v45 = vld [vmem:[%s2664_s29 + $0xf0] sm:$0xff] }
  0x84   : > { %849 = vmatprep.subr.mxu1 %v481_v49  ;;  %641 = vmatpush2.msra.mxu0 %v384_v50  ;;  %v239_v46 = vld [vmem:[%s2664_s29 + $0x100] sm:$0xff]  ;;  %v245_v48 = vld [vmem:[%s2664_s29 + $0x130] sm:$0xff]  ;;  %v546_v49 = vld [vmem:[#allocation5 + $0x6d8] sm:$0xff] }
  0x85   : > { %850 = vmatpush2.msra.mxu1 %v480_v51  ;;  %642 = vmatprep.subr.mxu0 %v382_v52  ;;  %v2749_v47 = vld [vmem:[%s2664_s29 + $0x120] sm:$0xff]  ;;  %v544_v51 = vld [vmem:[#allocation5 + $0x6c8] sm:$0xff]  ;;  %v2756_v52 = vld [vmem:[%s2664_s29 + $0x118] sm:$0xff] }
  0x86   : > { %851 = vmatprep.subr.mxu1 %v478_v53  ;;  %643 = vmatpush2.msra.mxu0 %v381_v54  ;;  %v359_v50 = vld [vmem:[#allocation5 + $0x100] sm:$0xff]  ;;  %v244_v53 = vld [vmem:[%s2664_s29 + $0x128] sm:$0xff] }
  0x87   : > { %852 = vmatpush2.msra.mxu1 %v477_v55  ;;  %644 = vmatprep.subr.mxu0 %v379_v56  ;;  %v2760_v54 = vld [vmem:[%s2664_s29 + $0x148] sm:$0xff]  ;;  %v250_v55 = vld [vmem:[%s2664_s29 + $0x158] sm:$0xff]  ;;  %v543_v56 = vld [vmem:[#allocation5 + $0x6c0] sm:$0xff] }
  0x88   : > { %853 = vmatprep.subr.mxu1 %v475_v57  ;;  %645 = vmatpush2.msra.mxu0 %v378_v58  ;;  %v356_v57 = vld [vmem:[#allocation5 + $0xe8] sm:$0xff]  ;;  %v541_v58 = vld [vmem:[#allocation5 + $0x6b0] sm:$0xff] }
  0x89   : > { %854 = vmatpush2.msra.mxu1 %v474_v59  ;;  %646 = vmatprep.subr.mxu0 %v376_v60  ;;  %v2767_v59 = vld [vmem:[%s2664_s29 + $0x140] sm:$0xff]  ;;  %v249_v60 = vld [vmem:[%s2664_s29 + $0x150] sm:$0xff] }
  0x8a   : > { %855 = vmatprep.subr.mxu1 %v472_v61  ;;  %647 = vmatpush2.msra.mxu0 %v375_v62  ;;  %v2771_v61 = vld [vmem:[%s2664_s29 + $0x170] sm:$0xff]  ;;  %v255_v62 = vld [vmem:[%s2664_s29 + $0x180] sm:$0xff] }
  0x8b   : > { %648 = vmatprep.mubr.f32.mxu0 %v2675_v63  ;;  %856 = vmatpush2.msra.mxu1 %v471_v0  ;;  %v353_v0 = vld [vmem:[#allocation5 + $0xd0] sm:$0xff] }
  0x8c   : > { %857 = vmatprep.mubr.f32.mxu1 %v210_v1  ;;  %649 = vmatmul.mubr.f32.vlgmr.msra.gmra.mxu0 %v2679_v2  ;;  %v540_v1 = vld [vmem:[#allocation5 + $0x6a8] sm:$0xff] }
  0x8d   : > { %858 = vmatmul.mubr.f32.vlgmr.msra.gmra.mxu1 %v209_v3  ;;  %1002 = vmatprep.subr.mxu0 %v565_v4  ;;  %v538_v3 = vld [vmem:[#allocation5 + $0x698] sm:$0xff]  ;;  %v2778_v4 = vld [vmem:[%s2664_s29 + $0x168] sm:$0xff] }
  0x8e   : > { %654 = vmatprep.mubr.f32.mxu0 %v2684_v5  ;;  %1003 = vmatpush1.msra.mxu0 %v564_v6  ;;  %v254_v6 = vld [vmem:[%s2664_s29 + $0x178] sm:$0xff] }
  0x8f   : > { %863 = vmatprep.mubr.f32.mxu1 %v215_v7  ;;  %1004 = vmatprep.subr.mxu0 %v562_v8  ;;  %v2782_v7 = vld [vmem:[%s2664_s29 + $0x198] sm:$0xff]  ;;  %v260_v8 = vld [vmem:[%s2664_s29 + $0x1a8] sm:$0xff] }
  0x90   : > { %1211 = vmatprep.subr.mxu1 %v2520_v14  ;;  %655 = vmatmul.mubr.f32.gmra.mxu0 %v2690_v9 }
  0x91   : > { %864 = vmatmul.mubr.f32.gmra.mxu1 %v214_v10  ;;  %660 = vmatprep.mubr.f32.mxu0 %v2694_v11  ;;  %v350_v10 = vld [vmem:[#allocation5 + $0xb8] sm:$0xff] }
  0x92   : > { %869 = vmatprep.mubr.f32.mxu1 %v220_v12  ;;  %1005 = vmatpush1.msra.mxu0 %v561_v13  ;;  %v537_v12 = vld [vmem:[#allocation5 + $0x690] sm:$0xff]  ;;  %v535_v13 = vld [vmem:[#allocation5 + $0x680] sm:$0xff] }
  0x93   : > { %1212 = vmatpush1.msra.mxu1 %v374_v15  ;;  %1006 = vmatprep.subr.mxu0 %v559_v16  ;;  %v2789_v15 = vld [vmem:[%s2664_s29 + $0x190] sm:$0xff]  ;;  %v259_v16 = vld [vmem:[%s2664_s29 + $0x1a0] sm:$0xff] }
  0x94   : > { %1213 = vmatprep.subr.mxu1 %v2520_v14  ;;  %661 = vmatmul.mubr.f32.gmra.mxu0 %v2701_v17 }
  0x95   : > { %870 = vmatmul.mubr.f32.gmra.mxu1 %v219_v18  ;;  %666 = vmatprep.mubr.f32.mxu0 %v2705_v19  ;;  %v2793_v18 = vld [vmem:[%s2664_s29 + $0x1c0] sm:$0xff] }
  0x96   : > { %875 = vmatprep.mubr.f32.mxu1 %v225_v20  ;;  %1007 = vmatpush1.msra.mxu0 %v558_v21  ;;  %v265_v20 = vld [vmem:[%s2664_s29 + $0x1d0] sm:$0xff]  ;;  %v347_v21 = vld [vmem:[#allocation5 + $0xa0] sm:$0xff] }
  0x97   : > { %1214 = vmatpush1.msra.mxu1 %v371_v22  ;;  %1008 = vmatprep.subr.mxu0 %v556_v23  ;;  %v534_v22 = vld [vmem:[#allocation5 + $0x678] sm:$0xff]  ;;  %v532_v23 = vld [vmem:[#allocation5 + $0x668] sm:$0xff] }
  0x98   : > { %1215 = vmatprep.subr.mxu1 %v2520_v14  ;;  %667 = vmatmul.mubr.f32.gmra.mxu0 %v2712_v24 }
  0x99   : > { %876 = vmatmul.mubr.f32.gmra.mxu1 %v224_v25  ;;  %672 = vmatprep.mubr.f32.mxu0 %v2716_v26  ;;  %v2800_v25 = vld [vmem:[%s2664_s29 + $0x1b8] sm:$0xff] }
  0x9a   : > { %881 = vmatprep.mubr.f32.mxu1 %v230_v27  ;;  %1009 = vmatpush1.msra.mxu0 %v555_v28  ;;  %v264_v27 = vld [vmem:[%s2664_s29 + $0x1c8] sm:$0xff] }
  0x9b   : > { %1216 = vmatpush1.msra.mxu1 %v368_v29  ;;  %1010 = vmatprep.subr.mxu0 %v553_v30  ;;  %v2804_v28 = vld [vmem:[%s2664_s29 + $0x1e8] sm:$0xff]  ;;  %v270_v29 = vld [vmem:[%s2664_s29 + $0x1f8] sm:$0xff] }
  0x9c   : > { %1217 = vmatprep.subr.mxu1 %v2520_v14  ;;  %673 = vmatmul.mubr.f32.gmra.mxu0 %v2723_v31  ;;  %v344_v30 = vld [vmem:[#allocation5 + $0x88] sm:$0xff] }
  0x9d   : > { %882 = vmatmul.mubr.f32.gmra.mxu1 %v229_v32  ;;  %678 = vmatprep.mubr.f32.mxu0 %v2727_v33  ;;  %v531_v32 = vld [vmem:[#allocation5 + $0x660] sm:$0xff] }
  0x9e   : > { %887 = vmatprep.mubr.f32.mxu1 %v235_v34  ;;  %1011 = vmatpush1.msra.mxu0 %v552_v35  ;;  %v529_v34 = vld [vmem:[#allocation5 + $0x650] sm:$0xff]  ;;  %v2811_v35 = vld [vmem:[%s2664_s29 + $0x1e0] sm:$0xff] }
  0x9f   : > { %1218 = vmatpush1.msra.mxu1 %v365_v36  ;;  %1012 = vmatprep.subr.mxu0 %v550_v37  ;;  %v269_v36 = vld [vmem:[%s2664_s29 + $0x1f0] sm:$0xff] }
  0xa0   : > { %1219 = vmatprep.subr.mxu1 %v2520_v14  ;;  %679 = vmatmul.mubr.f32.gmra.mxu0 %v2734_v38  ;;  %v2815_v37 = vld [vmem:[%s2664_s29 + $0x210] sm:$0xff] }
  0xa1   : > { %888 = vmatmul.mubr.f32.gmra.mxu1 %v234_v39  ;;  %684 = vmatprep.mubr.f32.mxu0 %v2738_v40  ;;  %v275_v39 = vld [vmem:[%s2664_s29 + $0x220] sm:$0xff] }
  0xa2   : > { %893 = vmatprep.mubr.f32.mxu1 %v240_v41  ;;  %1013 = vmatpush1.msra.mxu0 %v549_v42  ;;  %v341_v41 = vld [vmem:[#allocation5 + $0x70] sm:$0xff]  ;;  %v528_v42 = vld [vmem:[#allocation5 + $0x648] sm:$0xff] }
  0xa3   : > { %1220 = vmatpush1.msra.mxu1 %v362_v43  ;;  %1014 = vmatprep.subr.mxu0 %v547_v44  ;;  %v526_v43 = vld [vmem:[#allocation5 + $0x638] sm:$0xff]  ;;  %v2822_v44 = vld [vmem:[%s2664_s29 + $0x208] sm:$0xff] }
  0xa4   : > { %1221 = vmatprep.subr.mxu1 %v2520_v14  ;;  %685 = vmatmul.mubr.f32.gmra.mxu0 %v2745_v45 }
  0xa5   : > { %894 = vmatmul.mubr.f32.gmra.mxu1 %v239_v46  ;;  %690 = vmatprep.mubr.f32.mxu0 %v2749_v47  ;;  %v274_v46 = vld [vmem:[%s2664_s29 + $0x218] sm:$0xff] }
  0xa6   : > { %899 = vmatprep.mubr.f32.mxu1 %v245_v48  ;;  %1015 = vmatpush1.msra.mxu0 %v546_v49  ;;  %v2826_v48 = vld [vmem:[%s2664_s29 + $0x238] sm:$0xff]  ;;  %v280_v49 = vld [vmem:[%s2664_s29 + $0x248] sm:$0xff] }
  0xa7   : > { %1222 = vmatpush1.msra.mxu1 %v359_v50  ;;  %1016 = vmatprep.subr.mxu0 %v544_v51  ;;  %v338_v50 = vld [vmem:[#allocation5 + $0x58] sm:$0xff]  ;;  %v525_v51 = vld [vmem:[#allocation5 + $0x630] sm:$0xff] }
  0xa8   : > { %1223 = vmatprep.subr.mxu1 %v2520_v14  ;;  %691 = vmatmul.mubr.f32.gmra.mxu0 %v2756_v52 }
  0xa9   : > { %900 = vmatmul.mubr.f32.gmra.mxu1 %v244_v53  ;;  %696 = vmatprep.mubr.f32.mxu0 %v2760_v54  ;;  %v523_v53 = vld [vmem:[#allocation5 + $0x620] sm:$0xff] }
  0xaa   : > { %905 = vmatprep.mubr.f32.mxu1 %v250_v55  ;;  %1017 = vmatpush1.msra.mxu0 %v543_v56  ;;  %v2833_v55 = vld [vmem:[%s2664_s29 + $0x230] sm:$0xff]  ;;  %v279_v56 = vld [vmem:[%s2664_s29 + $0x240] sm:$0xff] }
  0xab   : > { %1224 = vmatpush1.msra.mxu1 %v356_v57  ;;  %1018 = vmatprep.subr.mxu0 %v541_v58  ;;  %v2837_v57 = vld [vmem:[%s2664_s29 + $0x260] sm:$0xff]  ;;  %v285_v58 = vld [vmem:[%s2664_s29 + $0x270] sm:$0xff] }
  0xac   : > { %1225 = vmatprep.subr.mxu1 %v2520_v14  ;;  %697 = vmatmul.mubr.f32.gmra.mxu0 %v2767_v59 }
  0xad   : > { %906 = vmatmul.mubr.f32.gmra.mxu1 %v249_v60  ;;  %702 = vmatprep.mubr.f32.mxu0 %v2771_v61  ;;  %v335_v60 = vld [vmem:[#allocation5 + $0x40] sm:$0xff] }
  0xae   : > { %911 = vmatprep.mubr.f32.mxu1 %v255_v62  ;;  %1226 = vmatpush1.msra.mxu1 %v353_v0  ;;  %v522_v62 = vld [vmem:[#allocation5 + $0x618] sm:$0xff]  ;;  %v520_v0 = vld [vmem:[#allocation5 + $0x608] sm:$0xff] }
  0xaf   : > { %1019 = vmatpush1.msra.mxu0 %v540_v1  ;;  %1227 = vmatprep.subr.mxu1 %v2520_v14  ;;  %v2844_v1 = vld [vmem:[%s2664_s29 + $0x258] sm:$0xff] }
  0xb0   : > { %1020 = vmatprep.subr.mxu0 %v538_v3  ;;  %703 = vmatmul.mubr.f32.gmra.mxu0 %v2778_v4  ;;  %v284_v3 = vld [vmem:[%s2664_s29 + $0x268] sm:$0xff] }
  0xb1   : > { %912 = vmatmul.mubr.f32.gmra.mxu1 %v254_v6  ;;  %708 = vmatprep.mubr.f32.mxu0 %v2782_v7  ;;  %v332_v6 = vld [vmem:[#allocation5 + $0x28] sm:$0xff] }
  0xb2   : > { %917 = vmatprep.mubr.f32.mxu1 %v260_v8  ;;  %1228 = vmatpush1.msra.mxu1 %v350_v10  ;;  %v2848_v8 = vld [vmem:[%s2664_s29 + $0x288] sm:$0xff]  ;;  %v290_v10 = vld [vmem:[%s2664_s29 + $0x298] sm:$0xff] }
  0xb3   : > { %1021 = vmatpush1.msra.mxu0 %v537_v12  ;;  %1229 = vmatprep.subr.mxu1 %v2520_v14  ;;  %v329_v12 = vld [vmem:[#allocation5 + $0x10] sm:$0xff] }
  0xb4   : > { %1022 = vmatprep.subr.mxu0 %v535_v13  ;;  %709 = vmatmul.mubr.f32.gmra.mxu0 %v2789_v15  ;;  %v519_v13 = vld [vmem:[#allocation5 + $0x600] sm:$0xff] }
  0xb5   : > { %918 = vmatmul.mubr.f32.gmra.mxu1 %v259_v16  ;;  %714 = vmatprep.mubr.f32.mxu0 %v2793_v18  ;;  %v2855_v16 = vld [vmem:[%s2664_s29 + $0x280] sm:$0xff] }
  0xb6   : > { %923 = vmatprep.mubr.f32.mxu1 %v265_v20  ;;  %1230 = vmatpush1.msra.mxu1 %v347_v21  ;;  %v289_v20 = vld [vmem:[%s2664_s29 + $0x290] sm:$0xff] }
  0xb7   : > { %1023 = vmatpush1.msra.mxu0 %v534_v22  ;;  %1231 = vmatprep.subr.mxu1 %v2520_v14  ;;  %v2860_v21 = vld [vmem:[%s2664_s29 + $0x2b0] sm:$0xff]  ;;  %v422_v22 = vld [vmem:[#allocation5 + $0x2f8] sm:$0xff] }
  0xb8   : > { %1024 = vmatprep.subr.mxu0 %v532_v23  ;;  %715 = vmatmul.mubr.f32.gmra.mxu0 %v2800_v25  ;;  %v295_v23 = vld [vmem:[%s2664_s29 + $0x2c0] sm:$0xff] }
  0xb9   : > { %924 = vmatmul.mubr.f32.gmra.mxu1 %v264_v27  ;;  %720 = vmatprep.mubr.f32.mxu0 %v2804_v28  ;;  %v419_v27 = vld [vmem:[#allocation5 + $0x2e0] sm:$0xff] }
  0xba   : > { %929 = vmatprep.mubr.f32.mxu1 %v270_v29  ;;  %1232 = vmatpush1.msra.mxu1 %v344_v30  ;;  %v2867_v29 = vld [vmem:[%s2664_s29 + $0x2a8] sm:$0xff]  ;;  %v294_v30 = vld [vmem:[%s2664_s29 + $0x2b8] sm:$0xff] }
  0xbb   : > { %1025 = vmatpush1.msra.mxu0 %v531_v32  ;;  %1233 = vmatprep.subr.mxu1 %v2520_v14  ;;  %v416_v32 = vld [vmem:[#allocation5 + $0x2c8] sm:$0xff] }
  0xbc   : > { %1026 = vmatprep.subr.mxu0 %v529_v34  ;;  %721 = vmatmul.mubr.f32.gmra.mxu0 %v2811_v35  ;;  %v2872_v34 = vld [vmem:[%s2664_s29 + $0x2d8] sm:$0xff] }
  0xbd   : > { %930 = vmatmul.mubr.f32.gmra.mxu1 %v269_v36  ;;  %726 = vmatprep.mubr.f32.mxu0 %v2815_v37  ;;  %v300_v36 = vld [vmem:[%s2664_s29 + $0x2e8] sm:$0xff] }
  0xbe   : > { %935 = vmatprep.mubr.f32.mxu1 %v275_v39  ;;  %1234 = vmatpush1.msra.mxu1 %v341_v41  ;;  %v413_v39 = vld [vmem:[#allocation5 + $0x2b0] sm:$0xff] }
  0xbf   : > { %1027 = vmatpush1.msra.mxu0 %v528_v42  ;;  %1235 = vmatprep.subr.mxu1 %v2520_v14  ;;  %v2879_v41 = vld [vmem:[%s2664_s29 + $0x2d0] sm:$0xff]  ;;  %v299_v42 = vld [vmem:[%s2664_s29 + $0x2e0] sm:$0xff] }
  0xc0   : > { %1028 = vmatprep.subr.mxu0 %v526_v43  ;;  %727 = vmatmul.mubr.f32.gmra.mxu0 %v2822_v44  ;;  %v410_v43 = vld [vmem:[#allocation5 + $0x298] sm:$0xff] }
  0xc1   : > { %936 = vmatmul.mubr.f32.gmra.mxu1 %v274_v46  ;;  %732 = vmatprep.mubr.f32.mxu0 %v2826_v48  ;;  %v2885_v46 = vld [vmem:[%s2664_s29 + $0x300] sm:$0xff] }
  0xc2   : > { %941 = vmatprep.mubr.f32.mxu1 %v280_v49  ;;  %1236 = vmatpush1.msra.mxu1 %v338_v50  ;;  %v305_v49 = vld [vmem:[%s2664_s29 + $0x310] sm:$0xff]  ;;  %v407_v50 = vld [vmem:[#allocation5 + $0x280] sm:$0xff] }
  0xc3   : > { %1029 = vmatpush1.msra.mxu0 %v525_v51  ;;  %1237 = vmatprep.subr.mxu1 %v2520_v14  ;;  %v2891_v51 = vld [vmem:[%s2664_s29 + $0x2f8] sm:$0xff] }
  0xc4   : > { %1030 = vmatprep.subr.mxu0 %v523_v53  ;;  %733 = vmatmul.mubr.f32.gmra.mxu0 %v2833_v55  ;;  %v304_v53 = vld [vmem:[%s2664_s29 + $0x308] sm:$0xff] }
  0xc5   : > { %942 = vmatmul.mubr.f32.gmra.mxu1 %v279_v56  ;;  %738 = vmatprep.mubr.f32.mxu0 %v2837_v57  ;;  %v404_v56 = vld [vmem:[#allocation5 + $0x268] sm:$0xff] }
  0xc6   : > { %947 = vmatprep.mubr.f32.mxu1 %v285_v58  ;;  %1238 = vmatpush1.msra.mxu1 %v335_v60  ;;  %v2897_v58 = vld [vmem:[%s2664_s29 + $0x328] sm:$0xff]  ;;  %v310_v60 = vld [vmem:[%s2664_s29 + $0x338] sm:$0xff] }
  0xc7   : > { %1031 = vmatpush1.msra.mxu0 %v522_v62  ;;  %1239 = vmatprep.subr.mxu1 %v2520_v14  ;;  %v401_v62 = vld [vmem:[#allocation5 + $0x250] sm:$0xff] }
  0xc8   : > { %1032 = vmatprep.subr.mxu0 %v520_v0  ;;  %739 = vmatmul.mubr.f32.gmra.mxu0 %v2844_v1  ;;  %v2903_v0 = vld [vmem:[%s2664_s29 + $0x320] sm:$0xff] }
  0xc9   : > { %948 = vmatmul.mubr.f32.gmra.mxu1 %v284_v3  ;;  %744 = vmatprep.mubr.f32.mxu0 %v2848_v8  ;;  %v309_v3 = vld [vmem:[%s2664_s29 + $0x330] sm:$0xff] }
  0xca   : > { %1240 = vmatpush1.msra.mxu1 %v332_v6  ;;  %953 = vmatprep.mubr.f32.mxu1 %v290_v10  ;;  %v398_v6 = vld [vmem:[#allocation5 + $0x238] sm:$0xff]  ;;  %v2909_v10 = vld [vmem:[%s2664_s29 + $0x350] sm:$0xff] }
  0xcb   : > { %1241 = vmatprep.subr.mxu1 %v2520_v14  ;;  %1033 = vmatpush1.msra.mxu0 %v519_v13  ;;  %v395_v13 = vld [vmem:[#allocation5 + $0x220] sm:$0xff] }
  0xcc   : > { %1242 = vmatpush1.msra.mxu1 %v329_v12  ;;  %745 = vmatmul.mubr.f32.gmra.mxu0 %v2855_v16  ;;  %v315_v12 = vld [vmem:[%s2664_s29 + $0x360] sm:$0xff] }
  0xcd   : > { %954 = vmatmul.mubr.f32.gmra.mxu1 %v289_v20  ;;  %1243 = vmatprep.subr.mxu1 %v2520_v14  ;;  %v2915_v20 = vld [vmem:[%s2664_s29 + $0x348] sm:$0xff] }
  0xce   : > { %750 = vmatprep.mubr.f32.mxu0 %v2860_v21  ;;  %1244 = vmatpush2.msra.mxu1 %v422_v22  ;;  %v314_v22 = vld [vmem:[%s2664_s29 + $0x358] sm:$0xff] }
  0xcf   : > { %959 = vmatprep.mubr.f32.mxu1 %v295_v23  ;;  %1245 = vmatprep.subr.mxu1 %v2520_v14  ;;  %v392_v23 = vld [vmem:[#allocation5 + $0x208] sm:$0xff] }
  0xd0   : > { %1396 = vmatprep.subr.mxu0 %v2520_v14  ;;  %1246 = vmatpush2.msra.mxu1 %v419_v27  ;;  %v2921_v27 = vld [vmem:[%s2664_s29 + $0x378] sm:$0xff] }
  0xd1   : > { %751 = vmatmul.mubr.f32.gmra.mxu0 %v2867_v29  ;;  %960 = vmatmul.mubr.f32.gmra.mxu1 %v294_v30  ;;  %v320_v30 = vld [vmem:[%s2664_s29 + $0x388] sm:$0xff] }
  0xd2   : > { %1247 = vmatprep.subr.mxu1 %v2520_v14  ;;  %756 = vmatprep.mubr.f32.mxu0 %v2872_v34 }
  0xd3   : > { %1248 = vmatpush2.msra.mxu1 %v416_v32  ;;  %965 = vmatprep.mubr.f32.mxu1 %v300_v36  ;;  %v389_v32 = vld [vmem:[#allocation5 + $0x1f0] sm:$0xff] }
  0xd4   : > { %1249 = vmatprep.subr.mxu1 %v2520_v14  ;;  %v2927_v36 = vld [vmem:[%s2664_s29 + $0x370] sm:$0xff] }
  0xd5   : > { %1250 = vmatpush2.msra.mxu1 %v413_v39  ;;  %757 = vmatmul.mubr.f32.gmra.mxu0 %v2879_v41  ;;  %v319_v39 = vld [vmem:[%s2664_s29 + $0x380] sm:$0xff] }
  0xd6   : > { %966 = vmatmul.mubr.f32.gmra.mxu1 %v299_v42  ;;  %1251 = vmatprep.subr.mxu1 %v2520_v14  ;;  %v386_v42 = vld [vmem:[#allocation5 + $0x1d8] sm:$0xff] }
  0xd7   : > { %1252 = vmatpush2.msra.mxu1 %v410_v43  ;;  %762 = vmatprep.mubr.f32.mxu0 %v2885_v46  ;;  %v2933_v43 = vld [vmem:[%s2664_s29 + $0x3a0] sm:$0xff] }
  0xd8   : > { %1253 = vmatprep.subr.mxu1 %v2520_v14  ;;  %971 = vmatprep.mubr.f32.mxu1 %v305_v49  ;;  %v325_v49 = vld [vmem:[%s2664_s29 + $0x3b0] sm:$0xff] }
  0xd9   : > { %1254 = vmatpush2.msra.mxu1 %v407_v50  ;;  %763 = vmatmul.mubr.f32.gmra.mxu0 %v2891_v51  ;;  %v383_v50 = vld [vmem:[#allocation5 + $0x1c0] sm:$0xff] }
  0xda   : > { %972 = vmatmul.mubr.f32.gmra.mxu1 %v304_v53  ;;  %1255 = vmatprep.subr.mxu1 %v2520_v14  ;;  %v2939_v53 = vld [vmem:[%s2664_s29 + $0x398] sm:$0xff] }
  0xdb   : > { %1256 = vmatpush2.msra.mxu1 %v404_v56  ;;  %768 = vmatprep.mubr.f32.mxu0 %v2897_v58  ;;  %v324_v56 = vld [vmem:[%s2664_s29 + $0x3a8] sm:$0xff] }
  0xdc   : > { %1257 = vmatprep.subr.mxu1 %v2520_v14  ;;  %977 = vmatprep.mubr.f32.mxu1 %v310_v60  ;;  %v380_v60 = vld [vmem:[#allocation5 + $0x1a8] sm:$0xff] }
  0xdd   : > { %1258 = vmatpush2.msra.mxu1 %v401_v62  ;;  %769 = vmatmul.mubr.f32.gmra.mxu0 %v2903_v0  ;;  %v377_v62 = vld [vmem:[#allocation5 + $0x190] sm:$0xff] }
  0xde   : > { %978 = vmatmul.mubr.f32.gmra.mxu1 %v309_v3  ;;  %1259 = vmatprep.subr.mxu1 %v2520_v14  ;;  %v2947_v3 = vld [vmem:[%s2664_s29 + $0x20] sm:$0xff] }
  0xdf   : > { %1260 = vmatpush2.msra.mxu1 %v398_v6  ;;  %774 = vmatprep.mubr.f32.mxu0 %v2909_v10  ;;  %v470_v6 = vld [vmem:[#allocation5 + $0x478] sm:$0xff] }
  0xe0   : > { %1261 = vmatprep.subr.mxu1 %v2520_v14  ;;  %983 = vmatprep.mubr.f32.mxu1 %v315_v12  ;;  %v566_v12 = vld [vmem:[#allocation5 + $0x778] sm:$0xff] }
  0xe1   : > { %1262 = vmatpush2.msra.mxu1 %v395_v13  ;;  %775 = vmatmul.mubr.f32.gmra.mxu0 %v2915_v20  ;;  %v2955_v13 = vld [vmem:[%s2664_s29 + $0x48] sm:$0xff] }
  0xe2   : > { %984 = vmatmul.mubr.f32.gmra.mxu1 %v314_v22  ;;  %1263 = vmatprep.subr.mxu1 %v2520_v14  ;;  %v467_v22 = vld [vmem:[#allocation5 + $0x460] sm:$0xff] }
  0xe3   : > { %1264 = vmatpush2.msra.mxu1 %v392_v23  ;;  %780 = vmatprep.mubr.f32.mxu0 %v2921_v27  ;;  %v461_v23 = vld [vmem:[#allocation5 + $0x430] sm:$0xff] }
  0xe4   : > { %1265 = vmatprep.subr.mxu1 %v2520_v14  ;;  %989 = vmatprep.mubr.f32.mxu1 %v320_v30  ;;  %v458_v30 = vld [vmem:[#allocation5 + $0x418] sm:$0xff] }
  0xe5   : > { %1266 = vmatpush2.msra.mxu1 %v389_v32  ;;  %781 = vmatmul.mubr.f32.gmra.mxu0 %v2927_v36  ;;  %v455_v32 = vld [vmem:[#allocation5 + $0x400] sm:$0xff] }
  0xe6   : > { %990 = vmatmul.mubr.f32.gmra.mxu1 %v319_v39  ;;  %1267 = vmatprep.subr.mxu1 %v2520_v14  ;;  %v449_v39 = vld [vmem:[#allocation5 + $0x3d0] sm:$0xff] }
  0xe7   : > { %1268 = vmatpush2.msra.mxu1 %v386_v42  ;;  %786 = vmatprep.mubr.f32.mxu0 %v2933_v43  ;;  %v446_v42 = vld [vmem:[#allocation5 + $0x3b8] sm:$0xff] }
  0xe8   : > { %1269 = vmatprep.subr.mxu1 %v2520_v14  ;;  %995 = vmatprep.mubr.f32.mxu1 %v325_v49  ;;  %v443_v49 = vld [vmem:[#allocation5 + $0x3a0] sm:$0xff] }
  0xe9   : > { %1270 = vmatpush2.msra.mxu1 %v383_v50  ;;  %787 = vmatmul.mubr.f32.gmra.mxu0 %v2939_v53  ;;  %v437_v50 = vld [vmem:[#allocation5 + $0x370] sm:$0xff] }
  0xea   : > { %996 = vmatmul.mubr.f32.gmra.mxu1 %v324_v56  ;;  %1271 = vmatprep.subr.mxu1 %v2520_v14  ;;  %v434_v56 = vld [vmem:[#allocation5 + $0x358] sm:$0xff] }
  0xeb   : > { %1272 = vmatpush2.msra.mxu1 %v380_v60  ;;  %1066 = vmatprep.mubr.f32.mxu0 %v2520_v14  ;;  %v431_v60 = vld [vmem:[#allocation5 + $0x340] sm:$0xff] }
  0xec   : > { %1273 = vmatprep.subr.mxu1 %v2520_v14  ;;  %1275 = vmatprep.mubr.f32.mxu1 %v2675_v63  ;;  %v464_v63 = vld [vmem:[#allocation5 + $0x448] sm:$0xff] }
  0xed   : > { %1274 = vmatpush2.msra.mxu1 %v377_v62  ;;  %1067 = vmatmul.mubr.f32.vlgmr.msra.gmra.mxu0 %v2947_v3  ;;  %v425_v62 = vld [vmem:[#allocation5 + $0x310] sm:$0xff] }
  0xee   : > { %1276 = vmatmul.mubr.f32.vlgmr.msra.gmra.mxu1 %v2679_v2  ;;  %1397 = vmatpush1.msra.mxu0 %v470_v6  ;;  %v2963_v2 = vld [vmem:[%s2664_s29 + $0x70] sm:$0xff]  ;;  %v518_v6 = vld [vmem:[#allocation5 + $0x5f8] sm:$0xff] }
  0xef   : > { %1072 = vmatprep.mubr.f32.mxu0 %v2520_v14  ;;  %1280 = vmatprep.mubr.f32.mxu1 %v2684_v5  ;;  %v563_v5 = vld [vmem:[#allocation5 + $0x760] sm:$0xff] }
  0xf0   : > { %1398 = vmatprep.subr.mxu0 %v2520_v14  ;;  %2058 = vmatprep.subr.mxu1 %v566_v12 }
  0xf1   : > { %1073 = vmatmul.mubr.f32.gmra.mxu0 %v2955_v13  ;;  %2059 = vmatpush3.msra.mxu1 %v566_v12  ;;  %v515_v12 = vld [vmem:[#allocation5 + $0x5e0] sm:$0xff] }
  0xf2   : > { %1281 = vmatmul.mubr.f32.gmra.mxu1 %v2690_v9  ;;  %1399 = vmatpush1.msra.mxu0 %v467_v22  ;;  %v2972_v9 = vld [vmem:[%s2664_s29 + $0x98] sm:$0xff]  ;;  %v509_v22 = vld [vmem:[#allocation5 + $0x5b0] sm:$0xff] }
  0xf3   : > { %1400 = vmatprep.subr.mxu0 %v2520_v14  ;;  %1078 = vmatprep.mubr.f32.mxu0 %v2520_v14 }
  0xf4   : > { %1285 = vmatprep.mubr.f32.mxu1 %v2694_v11  ;;  %1401 = vmatpush1.msra.mxu0 %v464_v63  ;;  %v560_v11 = vld [vmem:[#allocation5 + $0x748] sm:$0xff]  ;;  %v506_v63 = vld [vmem:[#allocation5 + $0x598] sm:$0xff] }
  0xf5   : > { %1079 = vmatmul.mubr.f32.gmra.mxu0 %v2963_v2  ;;  %1402 = vmatprep.subr.mxu0 %v2520_v14 }
  0xf6   : > { %1286 = vmatmul.mubr.f32.gmra.mxu1 %v2701_v17  ;;  %1403 = vmatpush1.msra.mxu0 %v461_v23  ;;  %v2980_v17 = vld [vmem:[%s2664_s29 + $0xc0] sm:$0xff] }
  0xf7   : > { %1084 = vmatprep.mubr.f32.mxu0 %v2520_v14  ;;  %1290 = vmatprep.mubr.f32.mxu1 %v2705_v19  ;;  %v452_v19 = vld [vmem:[#allocation5 + $0x3e8] sm:$0xff]  ;;  %v503_v23 = vld [vmem:[#allocation5 + $0x580] sm:$0xff] }
  0xf8   : > { %1404 = vmatprep.subr.mxu0 %v2520_v14  ;;  %2060 = vmatprep.subr.mxu1 %v563_v5 }
  0xf9   : > { %1085 = vmatmul.mubr.f32.gmra.mxu0 %v2972_v9  ;;  %2061 = vmatpush3.msra.mxu1 %v563_v5  ;;  %v497_v5 = vld [vmem:[#allocation5 + $0x550] sm:$0xff] }
  0xfa   : > { %1291 = vmatmul.mubr.f32.gmra.mxu1 %v2712_v24  ;;  %1405 = vmatpush1.msra.mxu0 %v458_v30  ;;  %v2988_v24 = vld [vmem:[%s2664_s29 + $0xe8] sm:$0xff]  ;;  %v494_v30 = vld [vmem:[#allocation5 + $0x538] sm:$0xff] }
  0xfb   : > { %1090 = vmatprep.mubr.f32.mxu0 %v2520_v14  ;;  %1295 = vmatprep.mubr.f32.mxu1 %v2716_v26  ;;  %v557_v26 = vld [vmem:[#allocation5 + $0x730] sm:$0xff] }
  0xfc   : > { %1406 = vmatprep.subr.mxu0 %v2520_v14  ;;  %2062 = vmatprep.subr.mxu1 %v560_v11 }
  0xfd   : > { %1091 = vmatmul.mubr.f32.gmra.mxu0 %v2980_v17  ;;  %2063 = vmatpush3.msra.mxu1 %v560_v11  ;;  %v491_v11 = vld [vmem:[#allocation5 + $0x520] sm:$0xff] }
  0xfe   : > { %1296 = vmatmul.mubr.f32.gmra.mxu1 %v2723_v31  ;;  %1407 = vmatpush1.msra.mxu0 %v455_v32  ;;  %v2997_v31 = vld [vmem:[%s2664_s29 + $0x110] sm:$0xff] }
  0xff   : > { %1408 = vmatprep.subr.mxu0 %v2520_v14  ;;  %1096 = vmatprep.mubr.f32.mxu0 %v2520_v14  ;;  %v485_v32 = vld [vmem:[#allocation5 + $0x4f0] sm:$0xff] }
 0x100   : > { %1300 = vmatprep.mubr.f32.mxu1 %v2727_v33  ;;  %1409 = vmatpush1.msra.mxu0 %v452_v19  ;;  %v554_v33 = vld [vmem:[#allocation5 + $0x718] sm:$0xff]  ;;  %v569_v19 = vlaneseq }
 0x101   : > { %1097 = vmatmul.mubr.f32.gmra.mxu0 %v2988_v24  ;;  %1410 = vmatprep.subr.mxu0 %v2520_v14 }
 0x102   : > { %1301 = vmatmul.mubr.f32.gmra.mxu1 %v2734_v38  ;;  %1411 = vmatpush1.msra.mxu0 %v449_v39  ;;  %v3005_v38 = vld [vmem:[%s2664_s29 + $0x138] sm:$0xff] }
 0x103   : > { %1102 = vmatprep.mubr.f32.mxu0 %v2520_v14  ;;  %1305 = vmatprep.mubr.f32.mxu1 %v2738_v40  ;;  %v440_v40 = vld [vmem:[#allocation5 + $0x388] sm:$0xff]  ;;  %v482_v39 = vld [vmem:[#allocation5 + $0x4d8] sm:$0xff] }
 0x104   : > { %1412 = vmatprep.subr.mxu0 %v2520_v14  ;;  %2064 = vmatprep.subr.mxu1 %v557_v26 }
 0x105   : > { %1103 = vmatmul.mubr.f32.gmra.mxu0 %v2997_v31  ;;  %2065 = vmatpush3.msra.mxu1 %v557_v26  ;;  %v3132_v26 = vshrl.u32 %v569_v19, 7  ;;  %v2348_v19 = vld [vmem:[%s2664_s29 + $0x88] sm:$0xff] }
 0x106   : > { %1306 = vmatmul.mubr.f32.gmra.mxu1 %v2745_v45  ;;  %1413 = vmatpush1.msra.mxu0 %v446_v42  ;;  %v3013_v45 = vld [vmem:[%s2664_s29 + $0x160] sm:$0xff]  ;;  %v476_v42 = vld [vmem:[#allocation5 + $0x4a8] sm:$0xff] }
 0x107   : > { %1108 = vmatprep.mubr.f32.mxu0 %v2520_v14  ;;  %1310 = vmatprep.mubr.f32.mxu1 %v2749_v47  ;;  %v551_v47 = vld [vmem:[#allocation5 + $0x700] sm:$0xff] }
 0x108   : > { %1414 = vmatprep.subr.mxu0 %v2520_v14  ;;  %2066 = vmatprep.subr.mxu1 %v554_v33 }
 0x109   : > { %1109 = vmatmul.mubr.f32.gmra.mxu0 %v3005_v38  ;;  %2067 = vmatpush3.msra.mxu1 %v554_v33  ;;  %v571_v33 = vsub.s32 0, %v3132_v26 }
 0x10a   : > { %1311 = vmatmul.mubr.f32.gmra.mxu1 %v2756_v52  ;;  %1415 = vmatpush1.msra.mxu0 %v443_v49  ;;  %v3022_v52 = vld [vmem:[%s2664_s29 + $0x188] sm:$0xff]  ;;  %v567_v49 = vld [vmem:[%s3650_s2] sm:$0x7] }
 0x10b   : > { %1416 = vmatprep.subr.mxu0 %v2520_v14  ;;  %1114 = vmatprep.mubr.f32.mxu0 %v2520_v14 }
 0x10c   : > { %1315 = vmatprep.mubr.f32.mxu1 %v2760_v54  ;;  %1417 = vmatpush1.msra.mxu0 %v440_v40  ;;  %v548_v54 = vld [vmem:[#allocation5 + $0x6e8] sm:$0xff]  ;;  %v575_v40 = vsub.s32 1, %v3132_v26 }
 0x10d   : > { %1115 = vmatmul.mubr.f32.gmra.mxu0 %v3013_v45  ;;  %1418 = vmatprep.subr.mxu0 %v2520_v14 }
 0x10e   : > { %1316 = vmatmul.mubr.f32.gmra.mxu1 %v2767_v59  ;;  %1419 = vmatpush1.msra.mxu0 %v437_v50  ;;  %v3030_v59 = vld [vmem:[%s2664_s29 + $0x1b0] sm:$0xff]  ;;  %v3153_v50 = vrot.slane %v567_v49, %v571_v33 }
 0x10f   : > { %1120 = vmatprep.mubr.f32.mxu0 %v2520_v14  ;;  %1320 = vmatprep.mubr.f32.mxu1 %v2771_v61  ;;  %v428_v61 = vld [vmem:[#allocation5 + $0x328] sm:$0xff] }
 0x110   : > { %1420 = vmatprep.subr.mxu0 %v2520_v14  ;;  %2068 = vmatprep.subr.mxu1 %v551_v47 }
 0x111   : > { %1121 = vmatmul.mubr.f32.gmra.mxu0 %v3022_v52  ;;  %2069 = vmatpush3.msra.mxu1 %v551_v47  ;;  %v2341_v47 = vld [vmem:[%s2664_s29 + $0x18] sm:$0xff] }
 0x112   : > { %1321 = vmatmul.mubr.f32.gmra.mxu1 %v2778_v4  ;;  %1421 = vmatpush1.msra.mxu0 %v434_v56  ;;  %v3038_v4 = vld [vmem:[%s2664_s29 + $0x1d8] sm:$0xff] }
 0x113   : > { %1126 = vmatprep.mubr.f32.mxu0 %v2520_v14  ;;  %1325 = vmatprep.mubr.f32.mxu1 %v2782_v7  ;;  %v545_v7 = vld [vmem:[#allocation5 + $0x6d0] sm:$0xff] }
 0x114   : > { %1422 = vmatprep.subr.mxu0 %v2520_v14  ;;  %2070 = vmatprep.subr.mxu1 %v548_v54 }
 0x115   : > { %1127 = vmatmul.mubr.f32.gmra.mxu0 %v3030_v59  ;;  %2071 = vmatpush3.msra.mxu1 %v548_v54 }
 0x116   : > { %1326 = vmatmul.mubr.f32.gmra.mxu1 %v2789_v15  ;;  %1423 = vmatpush1.msra.mxu0 %v431_v60  ;;  %v3047_v15 = vld [vmem:[%s2664_s29 + $0x200] sm:$0xff]  ;;  %v2342_v60 = vld [vmem:[%s2664_s29 + $0x10] sm:$0xff] }
 0x117   : > { %1424 = vmatprep.subr.mxu0 %v2520_v14  ;;  %1132 = vmatprep.mubr.f32.mxu0 %v2520_v14 }
 0x118   : > { %1330 = vmatprep.mubr.f32.mxu1 %v2793_v18  ;;  %1425 = vmatpush1.msra.mxu0 %v428_v61  ;;  %v542_v18 = vld [vmem:[#allocation5 + $0x6b8] sm:$0xff] }
 0x119   : > { %1133 = vmatmul.mubr.f32.gmra.mxu0 %v3038_v4  ;;  %1426 = vmatprep.subr.mxu0 %v2520_v14 }
 0x11a   : > { %1331 = vmatmul.mubr.f32.gmra.mxu1 %v2800_v25  ;;  %1427 = vmatpush1.msra.mxu0 %v425_v62  ;;  %v3055_v25 = vld [vmem:[%s2664_s29 + $0x228] sm:$0xff] }
 0x11b   : > { %1138 = vmatprep.mubr.f32.mxu0 %v2520_v14  ;;  %1335 = vmatprep.mubr.f32.mxu1 %v2804_v28  ;;  %v512_v28 = vld [vmem:[#allocation5 + $0x5c8] sm:$0xff] }
 0x11c   : > { %1428 = vmatprep.subr.mxu0 %v2520_v14  ;;  %2072 = vmatprep.subr.mxu1 %v545_v7 }
 0x11d   : > { %1139 = vmatmul.mubr.f32.gmra.mxu0 %v3047_v15  ;;  %2073 = vmatpush3.msra.mxu1 %v545_v7 }
 0x11e   : > { %1336 = vmatmul.mubr.f32.gmra.mxu1 %v2811_v35  ;;  %1429 = vmatpush2.msra.mxu0 %v518_v6  ;;  %v3063_v35 = vld [vmem:[%s2664_s29 + $0x250] sm:$0xff] }
 0x11f   : > { %1144 = vmatprep.mubr.f32.mxu0 %v2520_v14  ;;  %1340 = vmatprep.mubr.f32.mxu1 %v2815_v37  ;;  %v539_v37 = vld [vmem:[#allocation5 + $0x6a0] sm:$0xff] }
 0x120   : > { %1430 = vmatprep.subr.mxu0 %v2520_v14  ;;  %2074 = vmatprep.subr.mxu1 %v542_v18 }
 0x121   : > { %1145 = vmatmul.mubr.f32.gmra.mxu0 %v3055_v25  ;;  %2075 = vmatpush3.msra.mxu1 %v542_v18 }
 0x122   : > { %1341 = vmatmul.mubr.f32.gmra.mxu1 %v2822_v44  ;;  %1431 = vmatpush2.msra.mxu0 %v515_v12  ;;  %v3072_v44 = vld [vmem:[%s2664_s29 + $0x278] sm:$0xff] }
 0x123   : > { %1432 = vmatprep.subr.mxu0 %v2520_v14  ;;  %1150 = vmatprep.mubr.f32.mxu0 %v2520_v14  ;;  %v2344_v12 = vld [vmem:[%s2664_s29 + $0x38] sm:$0xff] }
 0x124   : > { %1345 = vmatprep.mubr.f32.mxu1 %v2826_v48  ;;  %1433 = vmatpush2.msra.mxu0 %v512_v28  ;;  %v536_v48 = vld [vmem:[#allocation5 + $0x688] sm:$0xff] }
 0x125   : > { %1151 = vmatmul.mubr.f32.gmra.mxu0 %v3063_v35  ;;  %1434 = vmatprep.subr.mxu0 %v2520_v14 }
 0x126   : > { %1346 = vmatmul.mubr.f32.gmra.mxu1 %v2833_v55  ;;  %1435 = vmatpush2.msra.mxu0 %v509_v22  ;;  %v3080_v55 = vld [vmem:[%s2664_s29 + $0x2a0] sm:$0xff]  ;;  %v2345_v22 = vld [vmem:[%s2664_s29 + $0x68] sm:$0xff] }
 0x127   : > { %1156 = vmatprep.mubr.f32.mxu0 %v2520_v14  ;;  %1350 = vmatprep.mubr.f32.mxu1 %v2837_v57  ;;  %v500_v57 = vld [vmem:[#allocation5 + $0x568] sm:$0xff] }
 0x128   : > { %1436 = vmatprep.subr.mxu0 %v2520_v14  ;;  %2076 = vmatprep.subr.mxu1 %v539_v37 }
 0x129   : > { %1157 = vmatmul.mubr.f32.gmra.mxu0 %v3072_v44  ;;  %2077 = vmatpush3.msra.mxu1 %v539_v37 }
 0x12a   : > { %1351 = vmatmul.mubr.f32.gmra.mxu1 %v2844_v1  ;;  %1437 = vmatpush2.msra.mxu0 %v506_v63  ;;  %v3088_v1 = vld [vmem:[%s2664_s29 + $0x2c8] sm:$0xff] }
 0x12b   : > { %1162 = vmatprep.mubr.f32.mxu0 %v2520_v14  ;;  %1355 = vmatprep.mubr.f32.mxu1 %v2848_v8  ;;  %v533_v8 = vld [vmem:[#allocation5 + $0x670] sm:$0xff] }
 0x12c   : > { %1438 = vmatprep.subr.mxu0 %v2520_v14  ;;  %2078 = vmatprep.subr.mxu1 %v536_v48 }
 0x12d   : > { %1163 = vmatmul.mubr.f32.gmra.mxu0 %v3080_v55  ;;  %2079 = vmatpush3.msra.mxu1 %v536_v48 }
 0x12e   : > { %1356 = vmatmul.mubr.f32.gmra.mxu1 %v2855_v16  ;;  %1439 = vmatpush2.msra.mxu0 %v503_v23  ;;  %v3097_v16 = vld [vmem:[%s2664_s29 + $0x2f0] sm:$0xff] }
 0x12f   : > { %1440 = vmatprep.subr.mxu0 %v2520_v14  ;;  %1168 = vmatprep.mubr.f32.mxu0 %v2520_v14 }
 0x130   : > { %1360 = vmatprep.mubr.f32.mxu1 %v2860_v21  ;;  %1441 = vmatpush2.msra.mxu0 %v500_v57  ;;  %v530_v21 = vld [vmem:[#allocation5 + $0x658] sm:$0xff] }
 0x131   : > { %1169 = vmatmul.mubr.f32.gmra.mxu0 %v3088_v1  ;;  %1442 = vmatprep.subr.mxu0 %v2520_v14 }
 0x132   : > { %1361 = vmatmul.mubr.f32.gmra.mxu1 %v2867_v29  ;;  %1443 = vmatpush2.msra.mxu0 %v497_v5  ;;  %v3105_v29 = vld [vmem:[%s2664_s29 + $0x318] sm:$0xff]  ;;  %v2346_v5 = vld [vmem:[%s2664_s29 + $0x60] sm:$0xff] }
 0x133   : > { %1174 = vmatprep.mubr.f32.mxu0 %v2520_v14  ;;  %1365 = vmatprep.mubr.f32.mxu1 %v2872_v34  ;;  %v488_v34 = vld [vmem:[#allocation5 + $0x508] sm:$0xff] }
 0x134   : > { %1444 = vmatprep.subr.mxu0 %v2520_v14  ;;  %2080 = vmatprep.subr.mxu1 %v533_v8 }
 0x135   : > { %1175 = vmatmul.mubr.f32.gmra.mxu0 %v3097_v16  ;;  %2081 = vmatpush3.msra.mxu1 %v533_v8 }
 0x136   : > { %1366 = vmatmul.mubr.f32.gmra.mxu1 %v2879_v41  ;;  %1445 = vmatpush2.msra.mxu0 %v494_v30  ;;  %v3113_v41 = vld [vmem:[%s2664_s29 + $0x340] sm:$0xff] }
 0x137   : > { %1180 = vmatprep.mubr.f32.mxu0 %v2520_v14  ;;  %1370 = vmatprep.mubr.f32.mxu1 %v2885_v46  ;;  %v527_v46 = vld [vmem:[#allocation5 + $0x640] sm:$0xff] }
 0x138   : > { %1446 = vmatprep.subr.mxu0 %v2520_v14  ;;  %2082 = vmatprep.subr.mxu1 %v530_v21 }
 0x139   : > { %1181 = vmatmul.mubr.f32.gmra.mxu0 %v3105_v29  ;;  %2083 = vmatpush3.msra.mxu1 %v530_v21  ;;  %v2347_v21 = vld [vmem:[%s2664_s29 + $0x90] sm:$0xff] }
 0x13a   : > { %1371 = vmatmul.mubr.f32.gmra.mxu1 %v2891_v51  ;;  %1447 = vmatpush2.msra.mxu0 %v491_v11  ;;  %v3122_v51 = vld [vmem:[%s2664_s29 + $0x368] sm:$0xff] }
 0x13b   : > { %1448 = vmatprep.subr.mxu0 %v2520_v14  ;;  %1186 = vmatprep.mubr.f32.mxu0 %v2520_v14 }
 0x13c   : > { %1375 = vmatprep.mubr.f32.mxu1 %v2897_v58  ;;  %1449 = vmatpush2.msra.mxu0 %v488_v34  ;;  %v524_v58 = vld [vmem:[#allocation5 + $0x628] sm:$0xff] }
 0x13d   : > { %1187 = vmatmul.mubr.f32.gmra.mxu0 %v3113_v41  ;;  %1450 = vmatprep.subr.mxu0 %v2520_v14 }
 0x13e   : > { %1376 = vmatmul.mubr.f32.gmra.mxu1 %v2903_v0  ;;  %1451 = vmatpush2.msra.mxu0 %v485_v32  ;;  %v3130_v0 = vld [vmem:[%s2664_s29 + $0x390] sm:$0xff] }
 0x13f   : > { %1192 = vmatprep.mubr.f32.mxu0 %v2520_v14  ;;  %1380 = vmatprep.mubr.f32.mxu1 %v2909_v10  ;;  %v479_v10 = vld [vmem:[#allocation5 + $0x4c0] sm:$0xff] }
 0x140   : > { %1452 = vmatprep.subr.mxu0 %v2520_v14  ;;  %2084 = vmatprep.subr.mxu1 %v527_v46 }
 0x141   : > { %1193 = vmatmul.mubr.f32.gmra.mxu0 %v3122_v51  ;;  %2085 = vmatpush3.msra.mxu1 %v527_v46 }
 0x142   : > { %1381 = vmatmul.mubr.f32.gmra.mxu1 %v2915_v20  ;;  %1453 = vmatpush2.msra.mxu0 %v482_v39  ;;  %v3140_v20 = vld [vmem:[%s2664_s29 + $0x3b8] sm:$0xff] }
 0x143   : > { %1198 = vmatprep.mubr.f32.mxu0 %v2520_v14  ;;  %1385 = vmatprep.mubr.f32.mxu1 %v2921_v27  ;;  %v473_v27 = vld [vmem:[#allocation5 + $0x490] sm:$0xff] }
 0x144   : > { %1454 = vmatprep.subr.mxu0 %v2520_v14  ;;  %2086 = vmatprep.subr.mxu1 %v524_v58 }
 0x145   : > { %1199 = vmatmul.mubr.f32.gmra.mxu0 %v3130_v0  ;;  %2087 = vmatpush3.msra.mxu1 %v524_v58 }
 0x146   : > { %1386 = vmatmul.mubr.f32.gmra.mxu1 %v2927_v36  ;;  %1455 = vmatpush2.msra.mxu0 %v479_v10  ;;  %v521_v36 = vld [vmem:[#allocation5 + $0x610] sm:$0xff]  ;;  %v2349_v10 = vld [vmem:[%s2664_s29 + $0xb8] sm:$0xff] }
 0x147   : > { %1456 = vmatprep.subr.mxu0 %v2520_v14  ;;  %1204 = vmatprep.mubr.f32.mxu0 %v2520_v14 }
 0x148   : > { %1390 = vmatprep.mubr.f32.mxu1 %v2933_v43  ;;  %1457 = vmatpush2.msra.mxu0 %v476_v42  ;;  %v3157_v43 = vrot.slane %v567_v49, %v575_v40 }
 0x149   : > { %1205 = vmatmul.mubr.f32.gmra.mxu0 %v3140_v20  ;;  %1458 = vmatprep.subr.mxu0 %v2520_v14 }
 0x14a   : > { %1391 = vmatmul.mubr.f32.gmra.mxu1 %v2939_v53  ;;  %1459 = vmatpush2.msra.mxu0 %v473_v27  ;;  %v2343_v53 = vld [vmem:[%s2664_s29 + $0x40] sm:$0xff] }
 0x14b   : > { %2088 = vmatprep.subr.mxu1 %v521_v36  ;;  %1460 = vmatprep.mubr.f32.mxu0 %v2341_v47 }
 0x14c   : > { %2089 = vmatpush3.msra.mxu1 %v521_v36  ;;  %2090 = vmatprep.mubr.f32.mxu1 %v2947_v3  ;;  %v650_v56 = vpop.f32.mrf.mxu0  ;;  %v2350_v36 = vld [vmem:[%s2664_s29 + $0xb0] sm:$0xff] }
 0x14d   : > { %v859_v54 = vpop.f32.mrf.mxu1  ;;  %1461 = vmatmul.mubr.f32.vlgmr.msra.gmra.mxu0 %v2342_v60  ;;  %v651_v14 = vadd.f32 %v650_v56, %v3153_v50  ;;  %v2351_v56 = vld [vmem:[%s2664_s29 + $0xe0] sm:$0xff] }
 0x14e   : > { %2091 = vmatmul.mubr.f32.vlgmr.msra.gmra.mxu1 %v2955_v13  ;;  %1465 = vmatprep.mubr.f32.mxu0 %v2343_v53  ;;  %v652_v61 = vpop.f32.mrf.mxu0 }
 0x14f   : > { %v861_v62 = vpop.f32.mrf.mxu1  ;;  %2093 = vmatprep.mubr.f32.mxu1 %v2963_v2  ;;  %v3164_v7 = vadd.f32 %v859_v54, %v651_v14  ;;  %v653_v3 = vadd.f32 %v652_v61, %v3157_v43  ;;  %v2352_v61 = vld [vmem:[%s2664_s29 + $0xd8] sm:$0xff] }
 0x150   : > { %v656_v6 = vpop.f32.mrf.mxu0 }
 0x151   : > { %v865_v18 = vpop.f32.mrf.mxu1  ;;  %1466 = vmatmul.mubr.f32.gmra.mxu0 %v2344_v12  ;;  %v3168_v28 = vadd.f32 %v861_v62, %v653_v3  ;;  %v657_v13 = vadd.f32 %v656_v6, %v3153_v50  ;;  %v2353_v6 = vld [vmem:[%s2664_s29 + $0x108] sm:$0xff] }
 0x152   : > { %1470 = vmatprep.mubr.f32.mxu0 %v2345_v22  ;;  %2094 = vmatmul.mubr.f32.gmra.mxu1 %v2972_v9  ;;  %v658_v37 = vpop.f32.mrf.mxu0 }
 0x153   : > { %v867_v2 = vpop.f32.mrf.mxu1  ;;  %2096 = vmatprep.mubr.f32.mxu1 %v2980_v17  ;;  %v3174_v63 = vadd.f32 %v865_v18, %v657_v13  ;;  %v659_v48 = vadd.f32 %v658_v37, %v3157_v43  ;;  %v2354_v37 = vld [vmem:[%s2664_s29 + $0x100] sm:$0xff] }
 0x154   : > { %v662_v23 = vpop.f32.mrf.mxu0 }
 0x155   : > { %v871_v57 = vpop.f32.mrf.mxu1  ;;  %1471 = vmatmul.mubr.f32.gmra.mxu0 %v2346_v5  ;;  %v3178_v8 = vadd.f32 %v867_v2, %v659_v48  ;;  %v663_v30 = vadd.f32 %v662_v23, %v3153_v50  ;;  %v2355_v23 = vld [vmem:[%s2664_s29 + $0x130] sm:$0xff] }
 0x156   : > { %1475 = vmatprep.mubr.f32.mxu0 %v2347_v21  ;;  %2097 = vmatmul.mubr.f32.gmra.mxu1 %v2988_v24  ;;  %v664_v9 = vpop.f32.mrf.mxu0 }
 0x157   : > { %v873_v17 = vpop.f32.mrf.mxu1  ;;  %2099 = vmatprep.mubr.f32.mxu1 %v2997_v31  ;;  %v3184_v11 = vadd.f32 %v871_v57, %v663_v30  ;;  %v665_v34 = vadd.f32 %v664_v9, %v3157_v43  ;;  %v2356_v9 = vld [vmem:[%s2664_s29 + $0x128] sm:$0xff] }
 0x158   : > { %v668_v32 = vpop.f32.mrf.mxu0 }
 0x159   : > { %v877_v46 = vpop.f32.mrf.mxu1  ;;  %1476 = vmatmul.mubr.f32.gmra.mxu0 %v2348_v19  ;;  %v3188_v39 = vadd.f32 %v873_v17, %v665_v34  ;;  %v669_v58 = vadd.f32 %v668_v32, %v3153_v50  ;;  %v2357_v32 = vld [vmem:[%s2664_s29 + $0x158] sm:$0xff] }
 0x15a   : > { %1480 = vmatprep.mubr.f32.mxu0 %v2349_v10  ;;  %2100 = vmatmul.mubr.f32.gmra.mxu1 %v3005_v38  ;;  %v670_v24 = vpop.f32.mrf.mxu0 }
 0x15b   : > { %v879_v31 = vpop.f32.mrf.mxu1  ;;  %2102 = vmatprep.mubr.f32.mxu1 %v3013_v45  ;;  %v3194_v42 = vadd.f32 %v877_v46, %v669_v58  ;;  %v671_v33 = vadd.f32 %v670_v24, %v3157_v43  ;;  %v2358_v24 = vld [vmem:[%s2664_s29 + $0x150] sm:$0xff] }
 0x15c   : > { %v674_v27 = vpop.f32.mrf.mxu0 }
 0x15d   : > { %v883_v49 = vpop.f32.mrf.mxu1  ;;  %1481 = vmatmul.mubr.f32.gmra.mxu0 %v2350_v36  ;;  %v3198_v40 = vadd.f32 %v879_v31, %v671_v33  ;;  %v675_v47 = vadd.f32 %v674_v27, %v3153_v50  ;;  %v2359_v27 = vld [vmem:[%s2664_s29 + $0x180] sm:$0xff] }
 0x15e   : > { %1485 = vmatprep.mubr.f32.mxu0 %v2351_v56  ;;  %2103 = vmatmul.mubr.f32.gmra.mxu1 %v3022_v52  ;;  %v676_v38 = vpop.f32.mrf.mxu0 }
 0x15f   : > { %v885_v45 = vpop.f32.mrf.mxu1  ;;  %2105 = vmatprep.mubr.f32.mxu1 %v3030_v59  ;;  %v3204_v54 = vadd.f32 %v883_v49, %v675_v47  ;;  %v677_v60 = vadd.f32 %v676_v38, %v3157_v43  ;;  %v2360_v38 = vld [vmem:[%s2664_s29 + $0x178] sm:$0xff] }
 0x160   : > { %v680_v14 = vpop.f32.mrf.mxu0 }
 0x161   : > { %v889_v53 = vpop.f32.mrf.mxu1  ;;  %1486 = vmatmul.mubr.f32.gmra.mxu0 %v2352_v61  ;;  %v3208_v62 = vadd.f32 %v885_v45, %v677_v60  ;;  %v681_v3 = vadd.f32 %v680_v14, %v3153_v50  ;;  %v2361_v14 = vld [vmem:[%s2664_s29 + $0x1a8] sm:$0xff] }
 0x162   : > { %1490 = vmatprep.mubr.f32.mxu0 %v2353_v6  ;;  %2106 = vmatmul.mubr.f32.gmra.mxu1 %v3038_v4  ;;  %v682_v52 = vpop.f32.mrf.mxu0 }
 0x163   : > { %v891_v59 = vpop.f32.mrf.mxu1  ;;  %2108 = vmatprep.mubr.f32.mxu1 %v3047_v15  ;;  %v3214_v18 = vadd.f32 %v889_v53, %v681_v3  ;;  %v683_v12 = vadd.f32 %v682_v52, %v3157_v43  ;;  %v2362_v52 = vld [vmem:[%s2664_s29 + $0x1a0] sm:$0xff] }
 0x164   : > { %v686_v13 = vpop.f32.mrf.mxu0 }
 0x165   : > { %v895_v22 = vpop.f32.mrf.mxu1  ;;  %1491 = vmatmul.mubr.f32.gmra.mxu0 %v2354_v37  ;;  %v3218_v2 = vadd.f32 %v891_v59, %v683_v12  ;;  %v687_v48 = vadd.f32 %v686_v13, %v3153_v50  ;;  %v2363_v13 = vld [vmem:[%s2664_s29 + $0x1d0] sm:$0xff] }
 0x166   : > { %1495 = vmatprep.mubr.f32.mxu0 %v2355_v23  ;;  %2109 = vmatmul.mubr.f32.gmra.mxu1 %v3055_v25  ;;  %v688_v4 = vpop.f32.mrf.mxu0 }
 0x167   : > { %v897_v15 = vpop.f32.mrf.mxu1  ;;  %2111 = vmatprep.mubr.f32.mxu1 %v3063_v35  ;;  %v3224_v57 = vadd.f32 %v895_v22, %v687_v48  ;;  %v689_v5 = vadd.f32 %v688_v4, %v3157_v43  ;;  %v2364_v4 = vld [vmem:[%s2664_s29 + $0x1c8] sm:$0xff] }
 0x168   : > { %v692_v30 = vpop.f32.mrf.mxu0 }
 0x169   : > { %v901_v21 = vpop.f32.mrf.mxu1  ;;  %1496 = vmatmul.mubr.f32.gmra.mxu0 %v2356_v9  ;;  %v3228_v17 = vadd.f32 %v897_v15, %v689_v5  ;;  %v693_v34 = vadd.f32 %v692_v30, %v3153_v50  ;;  %v2365_v30 = vld [vmem:[%s2664_s29 + $0x1f8] sm:$0xff] }
 0x16a   : > { %1500 = vmatprep.mubr.f32.mxu0 %v2357_v32  ;;  %2112 = vmatmul.mubr.f32.gmra.mxu1 %v3072_v44  ;;  %v694_v25 = vpop.f32.mrf.mxu0 }
 0x16b   : > { %v903_v35 = vpop.f32.mrf.mxu1  ;;  %2114 = vmatprep.mubr.f32.mxu1 %v3080_v55  ;;  %v3234_v46 = vadd.f32 %v901_v21, %v693_v34  ;;  %v695_v19 = vadd.f32 %v694_v25, %v3157_v43  ;;  %v2366_v25 = vld [vmem:[%s2664_s29 + $0x1f0] sm:$0xff] }
 0x16c   : > { %v698_v58 = vpop.f32.mrf.mxu0 }
 0x16d   : > { %v907_v10 = vpop.f32.mrf.mxu1  ;;  %1501 = vmatmul.mubr.f32.gmra.mxu0 %v2358_v24  ;;  %v3238_v31 = vadd.f32 %v903_v35, %v695_v19  ;;  %v699_v33 = vadd.f32 %v698_v58, %v3153_v50  ;;  %v2367_v58 = vld [vmem:[%s2664_s29 + $0x220] sm:$0xff] }
 0x16e   : > { %1505 = vmatprep.mubr.f32.mxu0 %v2359_v27  ;;  %2115 = vmatmul.mubr.f32.gmra.mxu1 %v3088_v1  ;;  %v700_v44 = vpop.f32.mrf.mxu0 }
 0x16f   : > { %v909_v55 = vpop.f32.mrf.mxu1  ;;  %2117 = vmatprep.mubr.f32.mxu1 %v3097_v16  ;;  %v3244_v49 = vadd.f32 %v907_v10, %v699_v33  ;;  %v701_v36 = vadd.f32 %v700_v44, %v3157_v43 }
 0x170   : > { %v704_v47 = vpop.f32.mrf.mxu0 }
 0x171   : > { %v913_v56 = vpop.f32.mrf.mxu1  ;;  %1506 = vmatmul.mubr.f32.gmra.mxu0 %v2360_v38  ;;  %v3248_v45 = vadd.f32 %v909_v55, %v701_v36  ;;  %v705_v60 = vadd.f32 %v704_v47, %v3153_v50  ;;  %v2368_v55 = vld [vmem:[%s2664_s29 + $0x218] sm:$0xff] }
 0x172   : > { %1510 = vmatprep.mubr.f32.mxu0 %v2361_v14  ;;  %2118 = vmatmul.mubr.f32.gmra.mxu1 %v3105_v29  ;;  %v706_v1 = vpop.f32.mrf.mxu0 }
 0x173   : > { %v915_v16 = vpop.f32.mrf.mxu1  ;;  %2120 = vmatprep.mubr.f32.mxu1 %v3113_v41  ;;  %v3254_v53 = vadd.f32 %v913_v56, %v705_v60  ;;  %v707_v61 = vadd.f32 %v706_v1, %v3157_v43  ;;  %v2369_v56 = vld [vmem:[%s2664_s29 + $0x248] sm:$0xff] }
 0x174   : > { %v710_v3 = vpop.f32.mrf.mxu0 }
 0x175   : > { %v919_v6 = vpop.f32.mrf.mxu1  ;;  %1511 = vmatmul.mubr.f32.gmra.mxu0 %v2362_v52  ;;  %v3258_v59 = vadd.f32 %v915_v16, %v707_v61  ;;  %v711_v12 = vadd.f32 %v710_v3, %v3153_v50  ;;  %v2370_v3 = vld [vmem:[%s2664_s29 + $0x240] sm:$0xff] }
 0x176   : > { %1515 = vmatprep.mubr.f32.mxu0 %v2363_v13  ;;  %2121 = vmatmul.mubr.f32.gmra.mxu1 %v3122_v51  ;;  %v712_v29 = vpop.f32.mrf.mxu0 }
 0x177   : > { %v921_v41 = vpop.f32.mrf.mxu1  ;;  %2123 = vmatprep.mubr.f32.mxu1 %v3130_v0  ;;  %v3264_v22 = vadd.f32 %v919_v6, %v711_v12  ;;  %v713_v37 = vadd.f32 %v712_v29, %v3157_v43  ;;  %v2371_v12 = vld [vmem:[%s2664_s29 + $0x270] sm:$0xff] }
 0x178   : > { %v716_v48 = vpop.f32.mrf.mxu0 }
 0x179   : > { %v925_v23 = vpop.f32.mrf.mxu1  ;;  %1516 = vmatmul.mubr.f32.gmra.mxu0 %v2364_v4  ;;  %v3268_v15 = vadd.f32 %v921_v41, %v713_v37  ;;  %v717_v5 = vadd.f32 %v716_v48, %v3153_v50  ;;  %v2372_v4 = vld [vmem:[%s2664_s29 + $0x268] sm:$0xff] }
 0x17a   : > { %1520 = vmatprep.mubr.f32.mxu0 %v2365_v30  ;;  %2124 = vmatmul.mubr.f32.gmra.mxu1 %v3140_v20  ;;  %v718_v51 = vpop.f32.mrf.mxu0 }
 0x17b   : > { %v927_v0 = vpop.f32.mrf.mxu1  ;;  %v3273_v21 = vadd.f32 %v925_v23, %v717_v5  ;;  %v719_v9 = vadd.f32 %v718_v51, %v3157_v43  ;;  %v2373_v51 = vld [vmem:[%s2664_s29 + $0x298] sm:$0xff] }
 0x17c   : > { %v722_v34 = vpop.f32.mrf.mxu0 }
 0x17d   : > { %v931_v32 = vpop.f32.mrf.mxu1  ;;  %1521 = vmatmul.mubr.f32.gmra.mxu0 %v2366_v25  ;;  %v3277_v35 = vadd.f32 %v927_v0, %v719_v9  ;;  %v723_v19 = vadd.f32 %v722_v34, %v3153_v50 }
 0x17e   : > { %1525 = vmatprep.mubr.f32.mxu0 %v2367_v58  ;;  %v724_v10 = vpop.f32.mrf.mxu0  ;;  %v2374_v58 = vld [vmem:[%s2664_s29 + $0x290] sm:$0xff] }
 0x17f   : > { %v933_v20 = vpop.f32.mrf.mxu1  ;;  %v3281_v24 = vadd.f32 %v931_v32, %v723_v19  ;;  %v725_v33 = vadd.f32 %v724_v10, %v3157_v43 }
 0x180   : > { %v728_v27 = vpop.f32.mrf.mxu0 }
 0x181   : > { %v937_v44 = vpop.f32.mrf.mxu1  ;;  %1526 = vmatmul.mubr.f32.gmra.mxu0 %v2368_v55  ;;  %v3285_v36 = vadd.f32 %v933_v20, %v725_v33  ;;  %v729_v47 = vadd.f32 %v728_v27, %v3153_v50  ;;  %v2375_v33 = vld [vmem:[%s2664_s29 + $0x2c0] sm:$0xff] }
 0x182   : > { %1530 = vmatprep.mubr.f32.mxu0 %v2369_v56  ;;  %v730_v38 = vpop.f32.mrf.mxu0 }
 0x183   : > { %v939_v60 = vpop.f32.mrf.mxu1  ;;  %v3289_v14 = vadd.f32 %v937_v44, %v729_v47  ;;  %v731_v1 = vadd.f32 %v730_v38, %v3157_v43  ;;  %v2376_v38 = vld [vmem:[%s2664_s29 + $0x2b8] sm:$0xff] }
 0x184   : > { %v734_v16 = vpop.f32.mrf.mxu0 }
 0x185   : > { %v943_v61 = vpop.f32.mrf.mxu1  ;;  %1531 = vmatmul.mubr.f32.gmra.mxu0 %v2370_v3  ;;  %v3293_v6 = vadd.f32 %v939_v60, %v731_v1  ;;  %v735_v52 = vadd.f32 %v734_v16, %v3153_v50 }
 0x186   : > { %1535 = vmatprep.mubr.f32.mxu0 %v2371_v12  ;;  %v736_v13 = vpop.f32.mrf.mxu0 }
 0x187   : > { %v945_v29 = vpop.f32.mrf.mxu1  ;;  %v3297_v41 = vadd.f32 %v943_v61, %v735_v52  ;;  %v737_v37 = vadd.f32 %v736_v13, %v3157_v43  ;;  %v2377_v61 = vld [vmem:[%s2664_s29 + $0x2e8] sm:$0xff] }
 0x188   : > { %v740_v48 = vpop.f32.mrf.mxu0 }
 0x189   : > { %v949_v23 = vpop.f32.mrf.mxu1  ;;  %1536 = vmatmul.mubr.f32.gmra.mxu0 %v2372_v4  ;;  %v3301_v5 = vadd.f32 %v945_v29, %v737_v37  ;;  %v741_v30 = vadd.f32 %v740_v48, %v3153_v50  ;;  %v2378_v37 = vld [vmem:[%s2664_s29 + $0x2e0] sm:$0xff] }
 0x18a   : > { %1540 = vmatprep.mubr.f32.mxu0 %v2373_v51  ;;  %v742_v0 = vpop.f32.mrf.mxu0 }
 0x18b   : > { %v951_v9 = vpop.f32.mrf.mxu1  ;;  %v3305_v34 = vadd.f32 %v949_v23, %v741_v30  ;;  %v743_v32 = vadd.f32 %v742_v0, %v3157_v43  ;;  %v2379_v30 = vld [vmem:[%s2664_s29 + $0x310] sm:$0xff] }
 0x18c   : > { %v746_v25 = vpop.f32.mrf.mxu0 }
 0x18d   : > { %v955_v19 = vpop.f32.mrf.mxu1  ;;  %1541 = vmatmul.mubr.f32.gmra.mxu0 %v2374_v58  ;;  %v3309_v10 = vadd.f32 %v951_v9, %v743_v32  ;;  %v747_v20 = vadd.f32 %v746_v25, %v3153_v50 }
 0x18e   : > { %1545 = vmatprep.mubr.f32.mxu0 %v2375_v33  ;;  %v748_v27 = vpop.f32.mrf.mxu0 }
 0x18f   : > { %v957_v44 = vpop.f32.mrf.mxu1  ;;  %v3313_v55 = vadd.f32 %v955_v19, %v747_v20  ;;  %v749_v47 = vadd.f32 %v748_v27, %v3157_v43  ;;  %v2380_v19 = vld [vmem:[%s2664_s29 + $0x308] sm:$0xff]  ;;  %v2381_v27 = vld [vmem:[%s2664_s29 + $0x338] sm:$0xff] }
 0x191   : > { %v752_v56 = vpop.f32.mrf.mxu0  ;;  %1546 = vmatmul.mubr.f32.gmra.mxu0 %v2376_v38  ;;  %v3317_v60 = vadd.f32 %v957_v44, %v749_v47  ;;  %v961_v16 = vpop.f32.mrf.mxu1 }
 0x192   : > { %v753_v1 = vadd.f32 %v752_v56, %v3153_v50  ;;  %1550 = vmatprep.mubr.f32.mxu0 %v2377_v61 }
 0x193   : > { %v754_v3 = vpop.f32.mrf.mxu0  ;;  %v963_v13 = vpop.f32.mrf.mxu1 }
 0x194   : > { %v3321_v52 = vadd.f32 %v961_v16, %v753_v1  ;;  %v755_v12 = vadd.f32 %v754_v3, %v3157_v43  ;;  %v2382_v16 = vld [vmem:[%s2664_s29 + $0x330] sm:$0xff] }
 0x195   : > { %v758_v29 = vpop.f32.mrf.mxu0  ;;  %1551 = vmatmul.mubr.f32.gmra.mxu0 %v2378_v37 }
 0x196   : > { %v3325_v48 = vadd.f32 %v963_v13, %v755_v12  ;;  %v759_v23 = vadd.f32 %v758_v29, %v3153_v50  ;;  %v967_v4 = vpop.f32.mrf.mxu1  ;;  %1555 = vmatprep.mubr.f32.mxu0 %v2379_v30  ;;  %v2383_v13 = vld [vmem:[%s2664_s29 + $0x360] sm:$0xff] }
 0x197   : > { %v760_v51 = vpop.f32.mrf.mxu0 }
 0x198   : > { %v3329_v0 = vadd.f32 %v967_v4, %v759_v23  ;;  %v761_v9 = vadd.f32 %v760_v51, %v3157_v43  ;;  %v969_v32 = vpop.f32.mrf.mxu1  ;;  %v2384_v51 = vld [vmem:[%s2664_s29 + $0x358] sm:$0xff] }
 0x199   : > { %v764_v25 = vpop.f32.mrf.mxu0  ;;  %1556 = vmatmul.mubr.f32.gmra.mxu0 %v2380_v19  ;;  %v2385_v19 = vld [vmem:[%s2664_s29 + $0x388] sm:$0xff] }
 0x19a   : > { %v3333_v58 = vadd.f32 %v969_v32, %v761_v9  ;;  %v765_v20 = vadd.f32 %v764_v25, %v3153_v50  ;;  %v973_v33 = vpop.f32.mrf.mxu1  ;;  %1560 = vmatprep.mubr.f32.mxu0 %v2381_v27 }
 0x19b   : > { %v766_v44 = vpop.f32.mrf.mxu0 }
 0x19c   : > { %v3337_v47 = vadd.f32 %v973_v33, %v765_v20  ;;  %v767_v56 = vadd.f32 %v766_v44, %v3157_v43  ;;  %v975_v38 = vpop.f32.mrf.mxu1 }
 0x19d   : > { %v770_v1 = vpop.f32.mrf.mxu0  ;;  %1561 = vmatmul.mubr.f32.gmra.mxu0 %v2382_v16 }
 0x19e   : > { %v3341_v61 = vadd.f32 %v975_v38, %v767_v56  ;;  %v771_v3 = vadd.f32 %v770_v1, %v3153_v50  ;;  %v979_v12 = vpop.f32.mrf.mxu1  ;;  %1565 = vmatprep.mubr.f32.mxu0 %v2383_v13  ;;  %v2386_v38 = vld [vmem:[%s2664_s29 + $0x380] sm:$0xff] }
 0x19f   : > { %v772_v29 = vpop.f32.mrf.mxu0 }
 0x1a0   : > { %v3345_v37 = vadd.f32 %v979_v12, %v771_v3  ;;  %v773_v23 = vadd.f32 %v772_v29, %v3157_v43  ;;  %v981_v4 = vpop.f32.mrf.mxu1  ;;  %v2387_v12 = vld [vmem:[%s2664_s29 + $0x3b0] sm:$0xff] }
 0x1a1   : > { %v776_v30 = vpop.f32.mrf.mxu0  ;;  %1566 = vmatmul.mubr.f32.gmra.mxu0 %v2384_v51  ;;  %v2388_v51 = vld [vmem:[%s2664_s29 + $0x3a8] sm:$0xff] }
 0x1a2   : > { %v3349_v9 = vadd.f32 %v981_v4, %v773_v23  ;;  %v777_v32 = vadd.f32 %v776_v30, %v3153_v50  ;;  %v985_v25 = vpop.f32.mrf.mxu1  ;;  %1570 = vmatprep.mubr.f32.mxu0 %v2385_v19 }
 0x1a3   : > { %v778_v20 = vpop.f32.mrf.mxu0 }
 0x1a4   : > { %v3353_v33 = vadd.f32 %v985_v25, %v777_v32  ;;  %v779_v27 = vadd.f32 %v778_v20, %v3157_v43  ;;  %v987_v44 = vpop.f32.mrf.mxu1 }
 0x1a5   : > { %v782_v56 = vpop.f32.mrf.mxu0  ;;  %1571 = vmatmul.mubr.f32.gmra.mxu0 %v2386_v38 }
 0x1a6   : > { %v3357_v1 = vadd.f32 %v987_v44, %v779_v27  ;;  %v783_v16 = vadd.f32 %v782_v56, %v3153_v50  ;;  %v991_v3 = vpop.f32.mrf.mxu1  ;;  %1575 = vmatprep.mubr.f32.mxu0 %v2387_v12 }
 0x1a7   : > { %v784_v13 = vpop.f32.mrf.mxu0 }
 0x1a8   : > { %v3361_v29 = vadd.f32 %v991_v3, %v783_v16  ;;  %v785_v23 = vadd.f32 %v784_v13, %v3157_v43  ;;  %v993_v4 = vpop.f32.mrf.mxu1 }
 0x1a9   : > { %v788_v30 = vpop.f32.mrf.mxu0  ;;  %1576 = vmatmul.mubr.f32.gmra.mxu0 %v2388_v51 }
 0x1aa   : > { %v3365_v32 = vadd.f32 %v993_v4, %v785_v23  ;;  %v789_v25 = vadd.f32 %v788_v30, %v3153_v50  ;;  %v997_v19 = vpop.f32.mrf.mxu1 }
 0x1ab   : > { %v790_v20 = vpop.f32.mrf.mxu0 }
 0x1ac   : > { %v3368_v27 = vadd.f32 %v997_v19, %v789_v25  ;;  %v791_v44 = vadd.f32 %v790_v20, %v3157_v43  ;;  %v999_v56 = vpop.f32.mrf.mxu1 }
 0x1ad   : > { %v1068_v38 = vpop.f32.mrf.mxu0 }
 0x1ae   : > { %v3371_v16 = vadd.f32 %v999_v56, %v791_v44  ;;  %v1069_v3 = vadd.f32 %v1068_v38, %v3164_v7  ;;  %v3374_v12 = vpop.f32.mrf.mxu1 }
 0x1af   : > { %v1070_v13 = vpop.f32.mrf.mxu0 }
 0x1b0   : > { %2197 = vtanh.f32 %v1069_v3  ;;  %v1071_v23 = vadd.f32 %v1070_v13, %v3168_v28  ;;  %v1279_v50 = vpop.f32.mrf.mxu1 }
 0x1b1   : > { %v1074_v4 = vpop.f32.mrf.mxu0 }
 0x1b2   : > { %2199 = vtanh.f32 %v1071_v23  ;;  %v1075_v30 = vadd.f32 %v1074_v4, %v3174_v63  ;;  %v3378_v51 = vpop.f32.mrf.mxu1 }
 0x1b3   : > { %v1076_v43 = vpop.f32.mrf.mxu0 }
 0x1b4   : > { %2201 = vtanh.f32 %v1075_v30  ;;  %v1077_v25 = vadd.f32 %v1076_v43, %v3178_v8  ;;  %v1284_v19 = vpop.f32.mrf.mxu1 }
 0x1b5   : > { %v1080_v7 = vpop.f32.mrf.mxu0 }
 0x1b6   : > { %2203 = vtanh.f32 %v1077_v25  ;;  %v1081_v20 = vadd.f32 %v1080_v7, %v3184_v11  ;;  %v3382_v44 = vpop.f32.mrf.mxu1 }
 0x1b7   : > { %v1082_v28 = vpop.f32.mrf.mxu0 }
 0x1b8   : > { %2205 = vtanh.f32 %v1081_v20  ;;  %v1083_v56 = vadd.f32 %v1082_v28, %v3188_v39  ;;  %v1289_v38 = vpop.f32.mrf.mxu1 }
 0x1b9   : > { %v1086_v63 = vpop.f32.mrf.mxu0 }
 0x1ba   : > { %2207 = vtanh.f32 %v1083_v56  ;;  %v1087_v3 = vadd.f32 %v1086_v63, %v3194_v42  ;;  %v3387_v13 = vpop.f32.mrf.mxu1 }
 0x1bb   : > { %v1088_v8 = vpop.f32.mrf.mxu0 }
 0x1bc   : > { %2209 = vtanh.f32 %v1087_v3  ;;  %v1089_v23 = vadd.f32 %v1088_v8, %v3198_v40  ;;  %v1294_v50 = vpop.f32.mrf.mxu1 }
 0x1bd   : > { %v2198_v11 = vpop.eup %2197  ;;  %v1092_v4 = vpop.f32.mrf.mxu0 }
 0x1be   : > { %1838 = vst [vmem:[%s3390_s21] sm:$0xff] %v2198_v11  ;;  %2211 = vtanh.f32 %v1089_v23  ;;  %v1093_v39 = vadd.f32 %v1092_v4, %v3204_v54  ;;  %v3394_v42 = vpop.f32.mrf.mxu1 }
 0x1bf   : > { %v2200_v30 = vpop.eup %2199  ;;  %v1094_v43 = vpop.f32.mrf.mxu0 }
 0x1c0   : > { %1839 = vst [vmem:[%s3390_s21 + $0x8] sm:$0xff] %v2200_v30  ;;  %2213 = vtanh.f32 %v1093_v39  ;;  %v1095_v40 = vadd.f32 %v1094_v43, %v3208_v62  ;;  %v1299_v25 = vpop.f32.mrf.mxu1 }
 0x1c1   : > { %v2202_v19 = vpop.eup %2201  ;;  %v1098_v7 = vpop.f32.mrf.mxu0 }
 0x1c2   : > { %1841 = vst [vmem:[%s3390_s21 + $0x18] sm:$0xff] %v2202_v19  ;;  %2215 = vtanh.f32 %v1095_v40  ;;  %v1099_v20 = vadd.f32 %v1098_v7, %v3214_v18  ;;  %v3400_v28 = vpop.f32.mrf.mxu1 }
 0x1c3   : > { %v2204_v54 = vpop.eup %2203  ;;  %v1100_v56 = vpop.f32.mrf.mxu0 }
 0x1c4   : > { %1842 = vst [vmem:[%s3390_s21 + $0x20] sm:$0xff] %v2204_v54  ;;  %2217 = vtanh.f32 %v1099_v20  ;;  %v1101_v38 = vadd.f32 %v1100_v56, %v3218_v2  ;;  %v1304_v63 = vpop.f32.mrf.mxu1 }
 0x1c5   : > { %v2206_v62 = vpop.eup %2205  ;;  %v1104_v3 = vpop.f32.mrf.mxu0 }
 0x1c6   : > { %1844 = vst [vmem:[%s3390_s21 + $0x30] sm:$0xff] %v2206_v62  ;;  %2219 = vtanh.f32 %v1101_v38  ;;  %v1105_v8 = vadd.f32 %v1104_v3, %v3224_v57  ;;  %v3406_v23 = vpop.f32.mrf.mxu1 }
 0x1c7   : > { %v2208_v18 = vpop.eup %2207  ;;  %v1106_v50 = vpop.f32.mrf.mxu0 }
 0x1c8   : > { %1845 = vst [vmem:[%s3390_s21 + $0x38] sm:$0xff] %v2208_v18  ;;  %2221 = vtanh.f32 %v1105_v8  ;;  %v1107_v11 = vadd.f32 %v1106_v50, %v3228_v17  ;;  %v1309_v4 = vpop.f32.mrf.mxu1 }
 0x1c9   : > { %v2210_v2 = vpop.eup %2209  ;;  %v1110_v39 = vpop.f32.mrf.mxu0 }
 0x1ca   : > { %1847 = vst [vmem:[%s3390_s21 + $0x48] sm:$0xff] %v2210_v2  ;;  %2223 = vtanh.f32 %v1107_v11  ;;  %v1111_v30 = vadd.f32 %v1110_v39, %v3234_v46  ;;  %v3412_v43 = vpop.f32.mrf.mxu1 }
 0x1cb   : > { %v2212_v57 = vpop.eup %2211  ;;  %v1112_v40 = vpop.f32.mrf.mxu0 }
 0x1cc   : > { %1848 = vst [vmem:[%s3390_s21 + $0x50] sm:$0xff] %v2212_v57  ;;  %2225 = vtanh.f32 %v1111_v30  ;;  %v1113_v25 = vadd.f32 %v1112_v40, %v3238_v31  ;;  %v1314_v19 = vpop.f32.mrf.mxu1 }
 0x1cd   : > { %v2214_v17 = vpop.eup %2213  ;;  %v1116_v7 = vpop.f32.mrf.mxu0 }
 0x1ce   : > { %1850 = vst [vmem:[%s3390_s21 + $0x60] sm:$0xff] %v2214_v17  ;;  %2227 = vtanh.f32 %v1113_v25  ;;  %v1117_v20 = vadd.f32 %v1116_v7, %v3244_v49  ;;  %v3418_v54 = vpop.f32.mrf.mxu1 }
 0x1cf   : > { %v2216_v46 = vpop.eup %2215  ;;  %v1118_v56 = vpop.f32.mrf.mxu0 }
 0x1d0   : > { %1851 = vst [vmem:[%s3390_s21 + $0x68] sm:$0xff] %v2216_v46  ;;  %2229 = vtanh.f32 %v1117_v20  ;;  %v1119_v38 = vadd.f32 %v1118_v56, %v3248_v45  ;;  %v1319_v63 = vpop.f32.mrf.mxu1 }
 0x1d1   : > { %v2218_v31 = vpop.eup %2217  ;;  %v1122_v62 = vpop.f32.mrf.mxu0 }
 0x1d2   : > { %1853 = vst [vmem:[%s3390_s21 + $0x78] sm:$0xff] %v2218_v31  ;;  %2231 = vtanh.f32 %v1119_v38  ;;  %v1123_v3 = vadd.f32 %v1122_v62, %v3254_v53  ;;  %v3424_v8 = vpop.f32.mrf.mxu1 }
 0x1d3   : > { %v2220_v49 = vpop.eup %2219  ;;  %v1124_v18 = vpop.f32.mrf.mxu0 }
 0x1d4   : > { %1854 = vst [vmem:[%s3390_s21 + $0x80] sm:$0xff] %v2220_v49  ;;  %2233 = vtanh.f32 %v1123_v3  ;;  %v1125_v50 = vadd.f32 %v1124_v18, %v3258_v59  ;;  %v1324_v11 = vpop.f32.mrf.mxu1 }
 0x1d5   : > { %v2222_v45 = vpop.eup %2221  ;;  %v1128_v4 = vpop.f32.mrf.mxu0 }
 0x1d6   : > { %1856 = vst [vmem:[%s3390_s21 + $0x90] sm:$0xff] %v2222_v45  ;;  %2235 = vtanh.f32 %v1125_v50  ;;  %v1129_v2 = vadd.f32 %v1128_v4, %v3264_v22  ;;  %v3430_v39 = vpop.f32.mrf.mxu1 }
 0x1d7   : > { %v2224_v53 = vpop.eup %2223  ;;  %v1130_v30 = vpop.f32.mrf.mxu0 }
 0x1d8   : > { %1857 = vst [vmem:[%s3390_s21 + $0x98] sm:$0xff] %v2224_v53  ;;  %2237 = vtanh.f32 %v1129_v2  ;;  %v1131_v57 = vadd.f32 %v1130_v30, %v3268_v15  ;;  %v1329_v40 = vpop.f32.mrf.mxu1 }
 0x1d9   : > { %v2226_v59 = vpop.eup %2225  ;;  %v1134_v25 = vpop.f32.mrf.mxu0 }
 0x1da   : > { %1859 = vst [vmem:[%s3390_s21 + $0xa8] sm:$0xff] %v2226_v59  ;;  %2239 = vtanh.f32 %v1131_v57  ;;  %v1135_v19 = vadd.f32 %v1134_v25, %v3273_v21  ;;  %v3436_v17 = vpop.f32.mrf.mxu1 }
 0x1db   : > { %v2228_v22 = vpop.eup %2227  ;;  %v1136_v7 = vpop.f32.mrf.mxu0 }
 0x1dc   : > { %1860 = vst [vmem:[%s3390_s21 + $0xb0] sm:$0xff] %v2228_v22  ;;  %2241 = vtanh.f32 %v1135_v19  ;;  %v1137_v20 = vadd.f32 %v1136_v7, %v3277_v35  ;;  %v1334_v46 = vpop.f32.mrf.mxu1 }
 0x1dd   : > { %v2230_v15 = vpop.eup %2229  ;;  %v1140_v56 = vpop.f32.mrf.mxu0 }
 0x1de   : > { %1862 = vst [vmem:[%s3390_s21 + $0xc0] sm:$0xff] %v2230_v15  ;;  %2243 = vtanh.f32 %v1137_v20  ;;  %v1141_v38 = vadd.f32 %v1140_v56, %v3281_v24  ;;  %v3442_v63 = vpop.f32.mrf.mxu1 }
 0x1df   : > { %v2232_v21 = vpop.eup %2231  ;;  %v1142_v31 = vpop.f32.mrf.mxu0 }
 0x1e0   : > { %1863 = vst [vmem:[%s3390_s21 + $0xc8] sm:$0xff] %v2232_v21  ;;  %2245 = vtanh.f32 %v1141_v38  ;;  %v1143_v62 = vadd.f32 %v1142_v31, %v3285_v36  ;;  %v1339_v3 = vpop.f32.mrf.mxu1 }
 0x1e1   : > { %v2234_v35 = vpop.eup %2233  ;;  %v1146_v49 = vpop.f32.mrf.mxu0 }
 0x1e2   : > { %1865 = vst [vmem:[%s3390_s21 + $0xd8] sm:$0xff] %v2234_v35  ;;  %2247 = vtanh.f32 %v1143_v62  ;;  %v1147_v18 = vadd.f32 %v1146_v49, %v3289_v14  ;;  %v3448_v50 = vpop.f32.mrf.mxu1 }
 0x1e3   : > { %v2236_v24 = vpop.eup %2235  ;;  %v1148_v11 = vpop.f32.mrf.mxu0 }
 0x1e4   : > { %1866 = vst [vmem:[%s3390_s21 + $0xe0] sm:$0xff] %v2236_v24  ;;  %2249 = vtanh.f32 %v1147_v18  ;;  %v1149_v45 = vadd.f32 %v1148_v11, %v3293_v6  ;;  %v1344_v4 = vpop.f32.mrf.mxu1 }
 0x1e5   : > { %v2238_v36 = vpop.eup %2237  ;;  %v1152_v2 = vpop.f32.mrf.mxu0 }
 0x1e6   : > { %1868 = vst [vmem:[%s3390_s21 + $0xf0] sm:$0xff] %v2238_v36  ;;  %2251 = vtanh.f32 %v1149_v45  ;;  %v1153_v53 = vadd.f32 %v1152_v2, %v3297_v41  ;;  %v3454_v30 = vpop.f32.mrf.mxu1 }
 0x1e7   : > { %v2240_v14 = vpop.eup %2239  ;;  %v1154_v57 = vpop.f32.mrf.mxu0 }
 0x1e8   : > { %1869 = vst [vmem:[%s3390_s21 + $0xf8] sm:$0xff] %v2240_v14  ;;  %2253 = vtanh.f32 %v1153_v53  ;;  %v1155_v40 = vadd.f32 %v1154_v57, %v3301_v5  ;;  %v1349_v59 = vpop.f32.mrf.mxu1 }
 0x1e9   : > { %v2242_v6 = vpop.eup %2241  ;;  %v1158_v25 = vpop.f32.mrf.mxu0 }
 0x1ea   : > { %1871 = vst [vmem:[%s3390_s21 + $0x108] sm:$0xff] %v2242_v6  ;;  %2255 = vtanh.f32 %v1155_v40  ;;  %v1159_v19 = vadd.f32 %v1158_v25, %v3305_v34  ;;  %v3460_v22 = vpop.f32.mrf.mxu1 }
 0x1eb   : > { %v2244_v41 = vpop.eup %2243  ;;  %v1160_v7 = vpop.f32.mrf.mxu0 }
 0x1ec   : > { %1872 = vst [vmem:[%s3390_s21 + $0x110] sm:$0xff] %v2244_v41  ;;  %2257 = vtanh.f32 %v1159_v19  ;;  %v1161_v20 = vadd.f32 %v1160_v7, %v3309_v10  ;;  %v1354_v46 = vpop.f32.mrf.mxu1 }
 0x1ed   : > { %v2246_v5 = vpop.eup %2245  ;;  %v1164_v15 = vpop.f32.mrf.mxu0 }
 0x1ee   : > { %1874 = vst [vmem:[%s3390_s21 + $0x120] sm:$0xff] %v2246_v5  ;;  %2259 = vtanh.f32 %v1161_v20  ;;  %v1165_v56 = vadd.f32 %v1164_v15, %v3313_v55  ;;  %v3466_v38 = vpop.f32.mrf.mxu1 }
 0x1ef   : > { %v2248_v34 = vpop.eup %2247  ;;  %v1166_v21 = vpop.f32.mrf.mxu0 }
 0x1f0   : > { %1875 = vst [vmem:[%s3390_s21 + $0x128] sm:$0xff] %v2248_v34  ;;  %2261 = vtanh.f32 %v1165_v56  ;;  %v1167_v31 = vadd.f32 %v1166_v21, %v3317_v60  ;;  %v1359_v62 = vpop.f32.mrf.mxu1 }
 0x1f1   : > { %v2250_v10 = vpop.eup %2249  ;;  %v1170_v3 = vpop.f32.mrf.mxu0  ;;  %v579_v62 = vsub.s32 2, %v3132_v26  ;;  %v2389_v26 = vld [vmem:[%s3650_s2] sm:$0x7] }
 0x1f2   : > { %1877 = vst [vmem:[%s3390_s21 + $0x138] sm:$0xff] %v2250_v10  ;;  %2263 = vtanh.f32 %v1167_v31  ;;  %v1171_v35 = vadd.f32 %v1170_v3, %v3321_v52  ;;  %v3472_v49 = vpop.f32.mrf.mxu1 }
 0x1f3   : > { %v2252_v55 = vpop.eup %2251  ;;  %v1172_v18 = vpop.f32.mrf.mxu0 }
 0x1f4   : > { %1878 = vst [vmem:[%s3390_s21 + $0x140] sm:$0xff] %v2252_v55  ;;  %2265 = vtanh.f32 %v1171_v35  ;;  %v1173_v24 = vadd.f32 %v1172_v18, %v3325_v48  ;;  %v1364_v11 = vpop.f32.mrf.mxu1 }
 0x1f5   : > { %v2254_v60 = vpop.eup %2253  ;;  %v1176_v45 = vpop.f32.mrf.mxu0  ;;  %v3508_v11 = vrot.slane %v2389_v26, %v579_v62 }
 0x1f6   : > { %1880 = vst [vmem:[%s3390_s21 + $0x150] sm:$0xff] %v2254_v60  ;;  %2267 = vtanh.f32 %v1173_v24  ;;  %v1177_v4 = vadd.f32 %v1176_v45, %v3329_v0  ;;  %v3478_v36 = vpop.f32.mrf.mxu1 }
 0x1f7   : > { %v2256_v52 = vpop.eup %2255  ;;  %v1178_v2 = vpop.f32.mrf.mxu0  ;;  %v1298_v26 = vadd.f32 %v3394_v42, %v3508_v11 }
 0x1f8   : > { %1881 = vst [vmem:[%s3390_s21 + $0x158] sm:$0xff] %v2256_v52  ;;  %2269 = vtanh.f32 %v1177_v4  ;;  %v1179_v53 = vadd.f32 %v1178_v2, %v3333_v58  ;;  %v1369_v14 = vpop.f32.mrf.mxu1 }
 0x1f9   : > { %v2258_v48 = vpop.eup %2257  ;;  %v1182_v57 = vpop.f32.mrf.mxu0  ;;  %v1278_v14 = vadd.f32 %v3374_v12, %v3508_v11 }
 0x1fa   : > { %1883 = vst [vmem:[%s3390_s21 + $0x168] sm:$0xff] %v2258_v48  ;;  %2271 = vtanh.f32 %v1179_v53  ;;  %v1183_v40 = vadd.f32 %v1182_v57, %v3337_v47  ;;  %v3484_v59 = vpop.f32.mrf.mxu1 }
 0x1fb   : > { %v2260_v0 = vpop.eup %2259  ;;  %v1184_v6 = vpop.f32.mrf.mxu0 }
 0x1fc   : > { %1884 = vst [vmem:[%s3390_s21 + $0x170] sm:$0xff] %v2260_v0  ;;  %2273 = vtanh.f32 %v1183_v40  ;;  %v1185_v25 = vadd.f32 %v1184_v6, %v3341_v61  ;;  %v1374_v19 = vpop.f32.mrf.mxu1 }
 0x1fd   : > { %v2262_v58 = vpop.eup %2261  ;;  %v1188_v41 = vpop.f32.mrf.mxu0  ;;  %v1283_v19 = vadd.f32 %v3378_v51, %v3508_v11 }
 0x1fe   : > { %1886 = vst [vmem:[%s3390_s21 + $0x180] sm:$0xff] %v2262_v58  ;;  %2275 = vtanh.f32 %v1185_v25  ;;  %v1189_v7 = vadd.f32 %v1188_v41, %v3345_v37  ;;  %v3490_v20 = vpop.f32.mrf.mxu1 }
 0x1ff   : > { %v2264_v47 = vpop.eup %2263  ;;  %v1190_v46 = vpop.f32.mrf.mxu0 }
 0x200   : > { %1887 = vst [vmem:[%s3390_s21 + $0x188] sm:$0xff] %v2264_v47  ;;  %2277 = vtanh.f32 %v1189_v7  ;;  %v1191_v5 = vadd.f32 %v1190_v46, %v3349_v9  ;;  %v1379_v15 = vpop.f32.mrf.mxu1 }
 0x201   : > { %v2266_v61 = vpop.eup %2265  ;;  %v1194_v56 = vpop.f32.mrf.mxu0  ;;  %v1288_v15 = vadd.f32 %v3382_v44, %v3508_v11 }
 0x202   : > { %1889 = vst [vmem:[%s3390_s21 + $0x198] sm:$0xff] %v2266_v61  ;;  %2279 = vtanh.f32 %v1191_v5  ;;  %v1195_v34 = vadd.f32 %v1194_v56, %v3353_v33  ;;  %v3496_v21 = vpop.f32.mrf.mxu1 }
 0x203   : > { %v2268_v37 = vpop.eup %2267  ;;  %v1196_v31 = vpop.f32.mrf.mxu0 }
 0x204   : > { %1890 = vst [vmem:[%s3390_s21 + $0x1a0] sm:$0xff] %v2268_v37  ;;  %2281 = vtanh.f32 %v1195_v34  ;;  %v1197_v10 = vadd.f32 %v1196_v31, %v3357_v1  ;;  %v1384_v9 = vpop.f32.mrf.mxu1 }
 0x205   : > { %v2270_v3 = vpop.eup %2269  ;;  %v1200_v35 = vpop.f32.mrf.mxu0 }
 0x206   : > { %1892 = vst [vmem:[%s3390_s21 + $0x1b0] sm:$0xff] %v2270_v3  ;;  %2283 = vtanh.f32 %v1197_v10  ;;  %v1201_v55 = vadd.f32 %v1200_v35, %v3361_v29  ;;  %v3503_v33 = vpop.f32.mrf.mxu1  ;;  %v1293_v10 = vadd.f32 %v3387_v13, %v3508_v11 }
 0x207   : > { %v2272_v18 = vpop.eup %2271  ;;  %v1202_v24 = vpop.f32.mrf.mxu0 }
 0x208   : > { %1893 = vst [vmem:[%s3390_s21 + $0x1b8] sm:$0xff] %v2272_v18  ;;  %2285 = vtanh.f32 %v1201_v55  ;;  %v1203_v1 = vadd.f32 %v1202_v24, %v3365_v32  ;;  %v1389_v60 = vpop.f32.mrf.mxu1 }
 0x209   : > { %v2274_v45 = vpop.eup %2273  ;;  %v1206_v4 = vpop.f32.mrf.mxu0 }
 0x20a   : > { %1895 = vst [vmem:[%s3390_s21 + $0x1c8] sm:$0xff] %v2274_v45  ;;  %2287 = vtanh.f32 %v1203_v1  ;;  %v1207_v29 = vadd.f32 %v1206_v4, %v3368_v27  ;;  %v3514_v52 = vpop.f32.mrf.mxu1 }
 0x20b   : > { %v2276_v2 = vpop.eup %2275  ;;  %v1208_v53 = vpop.f32.mrf.mxu0 }
 0x20c   : > { %1896 = vst [vmem:[%s3390_s21 + $0x1d0] sm:$0xff] %v2276_v2  ;;  %2289 = vtanh.f32 %v1207_v29  ;;  %v1209_v32 = vadd.f32 %v1208_v53, %v3371_v16  ;;  %v1394_v48 = vpop.f32.mrf.mxu1  ;;  %v1303_v2 = vadd.f32 %v3400_v28, %v3508_v11 }
 0x20d   : > { %v2278_v57 = vpop.eup %2277  ;;  %v1462_v40 = vpop.f32.mrf.mxu0 }
 0x20e   : > { %1898 = vst [vmem:[%s3390_s21 + $0x1e0] sm:$0xff] %v2278_v57  ;;  %2291 = vtanh.f32 %v1209_v32  ;;  %v1463_v0 = vadd.f32 %v1462_v40, %v1278_v14  ;;  %v2092_v27 = vpop.f32.mrf.mxu1  ;;  %v1308_v40 = vadd.f32 %v3406_v23, %v3508_v11 }
 0x20f   : > { %v2280_v6 = vpop.eup %2279  ;;  %v1464_v25 = vpop.f32.mrf.mxu0 }
 0x210   : > { %1899 = vst [vmem:[%s3390_s21 + $0x1e8] sm:$0xff] %v2280_v6  ;;  %v1647_v12 = vpop.f32.mrf.mxu1 }
 0x211   : > { %v2282_v58 = vpop.eup %2281  ;;  %v1648_v41 = vadd.f32 %v1647_v12, %v1463_v0  ;;  %v1467_v16 = vpop.f32.mrf.mxu0  ;;  %v1313_v12 = vadd.f32 %v3412_v43, %v3508_v11 }
 0x212   : > { %1901 = vst [vmem:[%s3390_s21 + $0x1f8] sm:$0xff] %v2282_v58  ;;  %v1468_v7 = vadd.f32 %v1467_v16, %v1283_v19  ;;  %v2095_v47 = vpop.f32.mrf.mxu1 }
 0x213   : > { %v2284_v46 = vpop.eup %2283  ;;  %2293 = vtanh.f32 %v1648_v41  ;;  %v1469_v5 = vpop.f32.mrf.mxu0 }
 0x214   : > { %1902 = vst [vmem:[%s3390_s21 + $0x200] sm:$0xff] %v2284_v46  ;;  %v1653_v61 = vadd.f32 %v2092_v27, %v1468_v7  ;;  %v1657_v34 = vpop.f32.mrf.mxu1  ;;  %v1318_v46 = vadd.f32 %v3418_v54, %v3508_v11 }
 0x215   : > { %v2286_v51 = vpop.eup %2285  ;;  %v1472_v56 = vpop.f32.mrf.mxu0 }
 0x216   : > { %1904 = vst [vmem:[%s3390_s21 + $0x210] sm:$0xff] %v2286_v51  ;;  %2295 = vtanh.f32 %v1653_v61  ;;  %v1473_v37 = vadd.f32 %v1472_v56, %v1288_v15  ;;  %v2098_v44 = vpop.f32.mrf.mxu1 }
 0x217   : > { %v2288_v31 = vpop.eup %2287  ;;  %v1474_v62 = vpop.f32.mrf.mxu0 }
 0x218   : > { %1905 = vst [vmem:[%s3390_s21 + $0x218] sm:$0xff] %v2288_v31  ;;  %v1658_v9 = vadd.f32 %v1657_v34, %v1473_v37  ;;  %v1667_v45 = vpop.f32.mrf.mxu1  ;;  %v1323_v34 = vadd.f32 %v3424_v8, %v3508_v11 }
 0x219   : > { %v2290_v3 = vpop.eup %2289  ;;  %v1477_v35 = vpop.f32.mrf.mxu0 }
 0x21a   : > { %1907 = vst [vmem:[%s3390_s21 + $0x228] sm:$0xff] %v2290_v3  ;;  %2297 = vtanh.f32 %v1658_v9  ;;  %v1478_v55 = vadd.f32 %v1477_v35, %v1293_v10  ;;  %v2101_v32 = vpop.f32.mrf.mxu1  ;;  %v1328_v3 = vadd.f32 %v3430_v39, %v3508_v11 }
 0x21b   : > { %v2292_v18 = vpop.eup %2291  ;;  %v1479_v24 = vpop.f32.mrf.mxu0 }
 0x21c   : > { %1908 = vst [vmem:[%s3390_s21 + $0x230] sm:$0xff] %v2292_v18  ;;  %v1663_v1 = vadd.f32 %v2095_v47, %v1478_v55  ;;  %v1677_v6 = vpop.f32.mrf.mxu1 }
 0x21d   : > { %v1482_v60 = vpop.f32.mrf.mxu0 }
 0x21e   : > { %2299 = vtanh.f32 %v1663_v1  ;;  %v1483_v13 = vadd.f32 %v1482_v60, %v1298_v26  ;;  %v2104_v16 = vpop.f32.mrf.mxu1  ;;  %v1333_v26 = vadd.f32 %v3436_v17, %v3508_v11 }
 0x21f   : > { %v1484_v4 = vpop.f32.mrf.mxu0 }
 0x220   : > { %v2294_v29 = vpop.eup %2293  ;;  %v1668_v53 = vadd.f32 %v1667_v45, %v1483_v13  ;;  %v1687_v61 = vpop.f32.mrf.mxu1 }
 0x221   : > { %1840 = vst [vmem:[%s3390_s21 + $0x10] sm:$0xff] %v2294_v29  ;;  %v1487_v14 = vpop.f32.mrf.mxu0  ;;  %v1338_v29 = vadd.f32 %v3442_v63, %v3508_v11 }
 0x222   : > { %2301 = vtanh.f32 %v1668_v53  ;;  %v1488_v48 = vadd.f32 %v1487_v14, %v1303_v2  ;;  %v2107_v62 = vpop.f32.mrf.mxu1 }
 0x223   : > { %v2296_v42 = vpop.eup %2295  ;;  %v1489_v57 = vpop.f32.mrf.mxu0 }
 0x224   : > { %1843 = vst [vmem:[%s3390_s21 + $0x28] sm:$0xff] %v2296_v42  ;;  %v1673_v0 = vadd.f32 %v2098_v44, %v1488_v48  ;;  %v1697_v55 = vpop.f32.mrf.mxu1  ;;  %v1343_v42 = vadd.f32 %v3448_v50, %v3508_v11 }
 0x225   : > { %v1492_v27 = vpop.f32.mrf.mxu0 }
 0x226   : > { %2303 = vtanh.f32 %v1673_v0  ;;  %v1493_v25 = vadd.f32 %v1492_v27, %v1308_v40  ;;  %v2110_v45 = vpop.f32.mrf.mxu1 }
 0x227   : > { %v2298_v28 = vpop.eup %2297  ;;  %v1494_v19 = vpop.f32.mrf.mxu0 }
 0x228   : > { %1846 = vst [vmem:[%s3390_s21 + $0x40] sm:$0xff] %v2298_v28  ;;  %v1678_v58 = vadd.f32 %v1677_v6, %v1493_v25  ;;  %v1707_v14 = vpop.f32.mrf.mxu1  ;;  %v1348_v25 = vadd.f32 %v3454_v30, %v3508_v11 }
 0x229   : > { %v1497_v41 = vpop.f32.mrf.mxu0 }
 0x22a   : > { %2305 = vtanh.f32 %v1678_v58  ;;  %v1498_v7 = vadd.f32 %v1497_v41, %v1313_v12  ;;  %v2113_v0 = vpop.f32.mrf.mxu1 }
 0x22b   : > { %v2300_v23 = vpop.eup %2299  ;;  %v1499_v47 = vpop.f32.mrf.mxu0 }
 0x22c   : > { %1849 = vst [vmem:[%s3390_s21 + $0x58] sm:$0xff] %v2300_v23  ;;  %v1683_v5 = vadd.f32 %v2101_v32, %v1498_v7  ;;  %v1717_v12 = vpop.f32.mrf.mxu1 }
 0x22d   : > { %v1502_v15 = vpop.f32.mrf.mxu0 }
 0x22e   : > { %2307 = vtanh.f32 %v1683_v5  ;;  %v1503_v51 = vadd.f32 %v1502_v15, %v1318_v46  ;;  %v2116_v47 = vpop.f32.mrf.mxu1  ;;  %v1358_v15 = vadd.f32 %v3466_v38, %v3508_v11 }
 0x22f   : > { %v2302_v43 = vpop.eup %2301  ;;  %v1504_v56 = vpop.f32.mrf.mxu0 }
 0x230   : > { %1852 = vst [vmem:[%s3390_s21 + $0x70] sm:$0xff] %v2302_v43  ;;  %v1688_v37 = vadd.f32 %v1687_v61, %v1503_v51  ;;  %v1727_v43 = vpop.f32.mrf.mxu1 }
 0x231   : > { %v1507_v31 = vpop.f32.mrf.mxu0 }
 0x232   : > { %2309 = vtanh.f32 %v1688_v37  ;;  %v1508_v10 = vadd.f32 %v1507_v31, %v1323_v34  ;;  %v1363_v37 = vadd.f32 %v3472_v49, %v3508_v11 }
 0x233   : > { %v2304_v54 = vpop.eup %2303  ;;  %v1509_v9 = vpop.f32.mrf.mxu0 }
 0x234   : > { %1855 = vst [vmem:[%s3390_s21 + $0x88] sm:$0xff] %v2304_v54  ;;  %v1693_v35 = vadd.f32 %v2104_v16, %v1508_v10  ;;  %v1353_v16 = vadd.f32 %v3460_v22, %v3508_v11  ;;  %v2119_v10 = vpop.f32.mrf.mxu1 }
 0x235   : > { %v1512_v44 = vpop.f32.mrf.mxu0 }
 0x236   : > { %2311 = vtanh.f32 %v1693_v35  ;;  %v1513_v18 = vadd.f32 %v1512_v44, %v1328_v3  ;;  %v1368_v3 = vadd.f32 %v3478_v36, %v3508_v11 }
 0x237   : > { %v2306_v8 = vpop.eup %2305  ;;  %v1514_v24 = vpop.f32.mrf.mxu0 }
 0x238   : > { %1858 = vst [vmem:[%s3390_s21 + $0xa0] sm:$0xff] %v2306_v8  ;;  %v1698_v1 = vadd.f32 %v1697_v55, %v1513_v18  ;;  %v1737_v55 = vpop.f32.mrf.mxu1  ;;  %v1373_v24 = vadd.f32 %v3484_v59, %v3508_v11 }
 0x239   : > { %v1517_v60 = vpop.f32.mrf.mxu0 }
 0x23a   : > { %2313 = vtanh.f32 %v1698_v1  ;;  %v1518_v13 = vadd.f32 %v1517_v60, %v1333_v26  ;;  %v2122_v60 = vpop.f32.mrf.mxu1 }
 0x23b   : > { %v2308_v39 = vpop.eup %2307  ;;  %v1519_v4 = vpop.f32.mrf.mxu0 }
 0x23c   : > { %1861 = vst [vmem:[%s3390_s21 + $0xb8] sm:$0xff] %v2308_v39  ;;  %v1703_v2 = vadd.f32 %v2107_v62, %v1518_v13  ;;  %v1378_v39 = vadd.f32 %v3490_v20, %v3508_v11 }
 0x23d   : > { %v1522_v53 = vpop.f32.mrf.mxu0 }
 0x23e   : > { %2315 = vtanh.f32 %v1703_v2  ;;  %v1523_v32 = vadd.f32 %v1522_v53, %v1338_v29  ;;  %v1747_v2 = vpop.f32.mrf.mxu1 }
 0x23f   : > { %v2310_v17 = vpop.eup %2309  ;;  %v1524_v48 = vpop.f32.mrf.mxu0 }
 0x240   : > { %1864 = vst [vmem:[%s3390_s21 + $0xd0] sm:$0xff] %v2310_v17  ;;  %v1708_v57 = vadd.f32 %v1707_v14, %v1523_v32  ;;  %v1383_v32 = vadd.f32 %v3496_v21, %v3508_v11 }
 0x241   : > { %v1527_v40 = vpop.f32.mrf.mxu0 }
 0x242   : > { %2317 = vtanh.f32 %v1708_v57  ;;  %v1528_v27 = vadd.f32 %v1527_v40, %v1343_v42  ;;  %v2125_v42 = vpop.f32.mrf.mxu1 }
 0x243   : > { %v2312_v63 = vpop.eup %2311  ;;  %v1529_v6 = vpop.f32.mrf.mxu0 }
 0x244   : > { %1867 = vst [vmem:[%s3390_s21 + $0xe8] sm:$0xff] %v2312_v63  ;;  %v1713_v28 = vadd.f32 %v2110_v45, %v1528_v27  ;;  %v1757_v6 = vpop.f32.mrf.mxu1 }
 0x245   : > { %v1532_v19 = vpop.f32.mrf.mxu0 }
 0x246   : > { %2319 = vtanh.f32 %v1713_v28  ;;  %v1533_v58 = vadd.f32 %v1532_v19, %v1348_v25  ;;  %v1393_v19 = vadd.f32 %v3514_v52, %v3508_v11 }
 0x247   : > { %v2314_v50 = vpop.eup %2313  ;;  %v1534_v41 = vpop.f32.mrf.mxu0 }
 0x248   : > { %1870 = vst [vmem:[%s3390_s21 + $0x100] sm:$0xff] %v2314_v50  ;;  %v1718_v7 = vadd.f32 %v1717_v12, %v1533_v58 }
 0x249   : > { %v1537_v23 = vpop.f32.mrf.mxu0 }
 0x24a   : > { %2321 = vtanh.f32 %v1718_v7  ;;  %v1538_v46 = vadd.f32 %v1537_v23, %v1353_v16 }
 0x24b   : > { %v2316_v30 = vpop.eup %2315  ;;  %v1539_v5 = vpop.f32.mrf.mxu0 }
 0x24c   : > { %1873 = vst [vmem:[%s3390_s21 + $0x118] sm:$0xff] %v2316_v30  ;;  %v1723_v61 = vadd.f32 %v2113_v0, %v1538_v46  ;;  %v1388_v0 = vadd.f32 %v3503_v33, %v3508_v11 }
 0x24d   : > { %v1542_v51 = vpop.f32.mrf.mxu0 }
 0x24e   : > { %2323 = vtanh.f32 %v1723_v61  ;;  %v1543_v56 = vadd.f32 %v1542_v51, %v1358_v15 }
 0x24f   : > { %v2318_v22 = vpop.eup %2317  ;;  %v1544_v34 = vpop.f32.mrf.mxu0 }
 0x250   : > { %1876 = vst [vmem:[%s3390_s21 + $0x130] sm:$0xff] %v2318_v22  ;;  %v1728_v31 = vadd.f32 %v1727_v43, %v1543_v56 }
 0x251   : > { %v1547_v62 = vpop.f32.mrf.mxu0 }
 0x252   : > { %2325 = vtanh.f32 %v1728_v31  ;;  %v1548_v54 = vadd.f32 %v1547_v62, %v1363_v37 }
 0x253   : > { %v2320_v38 = vpop.eup %2319  ;;  %v1549_v9 = vpop.f32.mrf.mxu0 }
 0x254   : > { %1879 = vst [vmem:[%s3390_s21 + $0x148] sm:$0xff] %v2320_v38  ;;  %v1733_v35 = vadd.f32 %v2116_v47, %v1548_v54 }
 0x255   : > { %v1552_v44 = vpop.f32.mrf.mxu0 }
 0x256   : > { %2327 = vtanh.f32 %v1733_v35  ;;  %v1553_v18 = vadd.f32 %v1552_v44, %v1368_v3 }
 0x257   : > { %v2322_v49 = vpop.eup %2321  ;;  %v1554_v8 = vpop.f32.mrf.mxu0 }
 0x258   : > { %1882 = vst [vmem:[%s3390_s21 + $0x160] sm:$0xff] %v2322_v49  ;;  %v1738_v26 = vadd.f32 %v1737_v55, %v1553_v18 }
 0x259   : > { %v1557_v1 = vpop.f32.mrf.mxu0 }
 0x25a   : > { %2329 = vtanh.f32 %v1738_v26  ;;  %v1558_v45 = vadd.f32 %v1557_v1, %v1373_v24 }
 0x25b   : > { %v2324_v36 = vpop.eup %2323  ;;  %v1559_v13 = vpop.f32.mrf.mxu0 }
 0x25c   : > { %1885 = vst [vmem:[%s3390_s21 + $0x178] sm:$0xff] %v2324_v36  ;;  %v1743_v4 = vadd.f32 %v2119_v10, %v1558_v45 }
 0x25d   : > { %v1562_v29 = vpop.f32.mrf.mxu0 }
 0x25e   : > { %2331 = vtanh.f32 %v1743_v4  ;;  %v1563_v53 = vadd.f32 %v1562_v29, %v1378_v39 }
 0x25f   : > { %v2326_v59 = vpop.eup %2325  ;;  %v1564_v14 = vpop.f32.mrf.mxu0 }
 0x260   : > { %1888 = vst [vmem:[%s3390_s21 + $0x190] sm:$0xff] %v2326_v59  ;;  %v1748_v17 = vadd.f32 %v1747_v2, %v1563_v53 }
 0x261   : > { %v1567_v48 = vpop.f32.mrf.mxu0 }
 0x262   : > { %2333 = vtanh.f32 %v1748_v17  ;;  %v1568_v57 = vadd.f32 %v1567_v48, %v1383_v32 }
 0x263   : > { %v2328_v20 = vpop.eup %2327  ;;  %v1569_v40 = vpop.f32.mrf.mxu0 }
 0x264   : > { %1891 = vst [vmem:[%s3390_s21 + $0x1a8] sm:$0xff] %v2328_v20  ;;  %v1753_v27 = vadd.f32 %v2122_v60, %v1568_v57 }
 0x265   : > { %v1572_v63 = vpop.f32.mrf.mxu0 }
 0x266   : > { %2335 = vtanh.f32 %v1753_v27  ;;  %v1573_v21 = vadd.f32 %v1572_v63, %v1388_v0 }
 0x267   : > { %v2330_v25 = vpop.eup %2329  ;;  %v1574_v28 = vpop.f32.mrf.mxu0 }
 0x268   : > { %1894 = vst [vmem:[%s3390_s21 + $0x1c0] sm:$0xff] %v2330_v25  ;;  %v1758_v12 = vadd.f32 %v1757_v6, %v1573_v21 }
 0x269   : > { %v1577_v33 = vpop.f32.mrf.mxu0 }
 0x26a   : > { %2337 = vtanh.f32 %v1758_v12  ;;  %v1578_v58 = vadd.f32 %v1577_v33, %v1393_v19 }
 0x26b   : > { %v2332_v50 = vpop.eup %2331  ;;  %v1579_v41 = vpop.f32.mrf.mxu0 }
 0x26c   : > { %1897 = vst [vmem:[%s3390_s21 + $0x1d8] sm:$0xff] %v2332_v50  ;;  %v1763_v16 = vadd.f32 %v2125_v42, %v1578_v58 }
 0x26e   : > { %2339 = vtanh.f32 %v1763_v16 }
 0x26f   : > { %v2334_v7 = vpop.eup %2333 }
 0x270   : > { %1900 = vst [vmem:[%s3390_s21 + $0x1f0] sm:$0xff] %v2334_v7 }
 0x273   : > { %v2336_v23 = vpop.eup %2335 }
 0x274   : > { %1903 = vst [vmem:[%s3390_s21 + $0x208] sm:$0xff] %v2336_v23 }
 0x277   : > { %v2338_v11 = vpop.eup %2337 }
 0x278   : > { %1906 = vst [vmem:[%s3390_s21 + $0x220] sm:$0xff] %v2338_v11 }
 0x27b   : > { %v2340_v52 = vpop.eup %2339 }
 0x27c   : > { %1909 = vst [vmem:[%s3390_s21 + $0x238] sm:$0xff] %v2340_v52 }
 0x27d   : > { %2457 = shalt.err (!%p2454_p3)
}
 0x27e   : > { %s2458_s28 = scalar_lea.hbm %s3602_s9, 9216  ;;  %s2462_s20 = scalar_lea.hbm %s3651_s3, 18432 }
 0x27f   : > { %p2459_p11 = scmp.ne.s32.totalorder %s3602_s9, %s2458_s28  ;;  %p2463_p4 = scmp.lt.s32.totalorder %s3602_s9, %s3651_s3 }
 0x280   : > { %p2464_p6 = scmp.lt.s32.totalorder %s2462_s20, %s2458_s28 }
 0x281   : > { %p2460_p9 = pnand %p2459_p11, %p3667_p5 }
 0x282   : > { %p2465_p8 = por %p2464_p6, %p2463_p4 }
 0x283   : > { %p2461_p1 = pneg %p2460_p9 }
 0x285   : > { %p2466_p0 = pnand %p2465_p8, %p2461_p1 }
 0x287   : > { %2469 = shalt.err (!%p2466_p0)
}
 0x288   : > { %s2522_s23 = smov 384   ;;  %s2523_s25 = smov 24  }
 0x289   : > { %2137 = dma.vmem_to_hbm [thread:$0]  (%p3667_p5), %s3604_s4, 9216, %s3602_s9, %s1911_s11, %s2522_s23, %s2522_s23, %s2523_s25  }
 0x28a PF: > { %s1940_s30 = sand.u32 1, %s2500_s12   ;;  %p3668_p7 = scmp.ne.s32.totalorder %s3657_s19, 0 }
 0x28b   : > { %p3669_p2 = scmp.ge.s32.totalorder %s2512_s15, 2  ;;  %s1941_s7 = scalar_lea.sflag [#allocation4], %s1940_s30 }
 0x28d   : > { %p2148_p10 = pnand %p3669_p2, %p3668_p7 }
 0x28f   : > { %p2149_p12 = pneg %p2148_p10 }
 0x291   : > { %2495 = dma.done.wait (%p2149_p12), %s1941_s7, 9216  }
 0x292   : > { %2497 = vsyncadd (%p2149_p12), %s1941_s7, 4294958080  ;;  %p17_p13 = scmp.ge.s32.totalorder %s2598_s24, 4   ;;  %s3670_s12 = smov %s2504_s13 }
 0x293   : > { %s3671_s13 = smov %s2508_s14  ;;  %s3672_s14 = smov %s2614_s5 }
 0x294   : > { %s3673_s15 = smov %s2598_s24  ;;  %19 = sbr.rel (!%p17_p13) target bundleno = 6 (0x6), region = 81 }
 0x299   :  { %1946 = vsyncpa [#allocation3], 1 }
 0x29a   :  { %1948 = vsyncpa [#allocation3 + $0x1], 1 }
 0x29b   :  { %1949 = vsyncpa [#allocation6], 1 }
 0x29c   :  { %1950 = vsyncpa [#allocation4], 1 }
 0x29d   :  { %1952 = vsyncpa [#allocation4 + $0x1], 1 }

</bundles_post_ra>
